<compile_context>
chip_gen: v7x
topology: tpu7x:2x2x1
jax: 0.10.0
libtpu: 0.0.40
codegen_flags: <defaults>
</compile_context>

<pallas_src>
import functools

import jax
import jax.numpy as jnp
from jax.experimental import pallas as pl
from jax.experimental.pallas import tpu as pltpu


def _round_up(x, m):
    return ((x + m - 1) // m) * m


def _leaky_relu(x, slope=0.2):
    # max(x, slope*x) == LeakyReLU(slope) for slope in (0, 1): mul+max, no select.
    return jnp.maximum(x, slope * x)


def generator_kernel(p_ref,
                     w1_ref, b1_ref,
                     w2_ref, b2_ref,
                     w3_ref, b3_ref,
                     w4_ref, b4_ref,
                     o_ref):
    # Linear(latent -> 256) + LeakyReLU(0.2); bf16 MXU inputs, f32 accumulate.
    h = jnp.dot(p_ref[...], w1_ref[...], preferred_element_type=jnp.float32)
    h = _leaky_relu(h + b1_ref[...])
    # Linear(256 -> 512) + LeakyReLU(0.2)
    h = jnp.dot(h.astype(jnp.bfloat16), w2_ref[...], preferred_element_type=jnp.float32)
    h = _leaky_relu(h + b2_ref[...])
    # Linear(512 -> 1024) + LeakyReLU(0.2)
    h = jnp.dot(h.astype(jnp.bfloat16), w3_ref[...], preferred_element_type=jnp.float32)
    h = _leaky_relu(h + b3_ref[...])
    # Linear(1024 -> image_size*image_size) + Tanh; narrow store (bf16 by default).
    h = jnp.dot(h.astype(jnp.bfloat16), w4_ref[...], preferred_element_type=jnp.float32)
    o_ref[...] = jnp.tanh(h + b4_ref[...]).astype(o_ref.dtype)


def init_generator_params(key, latent_size, image_size):
    """Deterministic synthetic parameters (PyTorch-Linear-like uniform init).

    Weights are stored in bf16 (halves HBM weight traffic); biases stay f32.
    """
    dims = [latent_size, 256, 512, 1024, image_size * image_size]
    params = []
    for i in range(4):
        fan_in, fan_out = dims[i], dims[i + 1]
        key, kw, kb = jax.random.split(key, 3)
        bound = 1.0 / float(fan_in) ** 0.5
        w = jax.random.uniform(kw, (fan_in, fan_out), jnp.float32, -bound, bound)
        b = jax.random.uniform(kb, (1, fan_out), jnp.float32, -bound, bound)
        params.extend([w.astype(jnp.bfloat16), b])
    return params


def _vmem_limit_bytes():
    """128-MiB-VMEM chips (v5e/v6e) get a high limit; default stays v7x-safe."""
    try:
        kind = jax.devices()[0].device_kind.lower()
    except Exception:  # pragma: no cover - be conservative if query fails
        kind = ""
    if "v5" in kind or "v6" in kind:
        return 100 * 1024 * 1024
    return 32 * 1024 * 1024  # v7x (64 MiB physical / 32 MiB scoped) and unknown


@functools.partial(jax.jit, static_argnames=("image_size", "tm", "out_dtype"))
def generator_forward(p_hat, params, image_size, tm=1024, out_dtype=jnp.bfloat16):
    """Generator.forward(p_hat, x) -- `x` is unused by the PyTorch module."""
    w1, b1, w2, b2, w3, b3, w4, b4 = params
    B, latent = p_hat.shape
    out_dim = image_size * image_size

    # Lane-dense output: pad out_dim (and W4/b4 columns) to a multiple of 128
    # so the (TM, out_dim) stores are unmasked; padded columns sliced off below.
    out_dim_p = max(_round_up(out_dim, 128), 128)
    if out_dim_p != out_dim:
        w4 = jnp.pad(w4, ((0, 0), (0, out_dim_p - out_dim)))
        b4 = jnp.pad(b4, ((0, 0), (0, out_dim_p - out_dim)))
    params = (w1, b1, w2, b2, w3, b3, w4, b4)

    out_bytes = jnp.dtype(out_dtype).itemsize
    vmem_limit = _vmem_limit_bytes()
    vmem_budget = vmem_limit - 4 * 1024 * 1024  # headroom for compiler scratch

    # out_dim-aware TM cap: double-buffered in/out tiles + widest f32 hidden
    # temporaries + (double-buffered) weights must fit the VMEM budget.
    weight_bytes_2x = 2 * sum(int(p.size) * p.dtype.itemsize for p in params)
    bytes_per_row = (2 * latent * 2              # input tile, bf16, 2 buffers
                     + 2 * out_dim_p * out_bytes  # output tile, 2 buffers
                     + (1024 + 512) * 4)          # f32 hidden temporaries
    tm_cap = max(8, ((vmem_budget - weight_bytes_2x) // bytes_per_row) // 8 * 8)
    tm_cap = min(tm, tm_cap)

    # Tile count: minimize padded rows (pad < 8*n_tiles instead of < TM), and
    # guarantee >= 2 grid steps so the "parallel" axis feeds both v7x TCs.
    n_tiles = max(1, -(-B // tm_cap))
    if n_tiles == 1 and B >= 16:
        n_tiles = 2
    TM = _round_up(-(-B // n_tiles), 8)
    B_pad = TM * n_tiles
    if B_pad != B:
        p_hat = jnp.pad(p_hat, ((0, B_pad - B), (0, 0)))
    p_hat = p_hat.astype(jnp.bfloat16)

    const_map = lambda i: (0, 0)
    weight_specs = []
    for w, b in ((w1, b1), (w2, b2), (w3, b3), (w4, b4)):
        weight_specs.append(pl.BlockSpec(w.shape, const_map))  # VMEM-resident
        weight_specs.append(pl.BlockSpec(b.shape, const_map))

    flops = 2 * B_pad * (latent * 256 + 256 * 512 + 512 * 1024 + 1024 * out_dim_p)
    bytes_accessed = (weight_bytes_2x // 2
                      + B_pad * (latent * 2 + out_dim_p * out_bytes))

    out = pl.pallas_call(
        generator_kernel,
        out_shape=jax.ShapeDtypeStruct((B_pad, out_dim_p), out_dtype),
        grid=(n_tiles,),
        in_specs=[pl.BlockSpec((TM, latent), lambda i: (i, 0))] + weight_specs,
        out_specs=pl.BlockSpec((TM, out_dim_p), lambda i: (i, 0)),
        compiler_params=pltpu.CompilerParams(
            dimension_semantics=("parallel",),
            vmem_limit_bytes=int(vmem_limit),
        ),
        cost_estimate=pl.CostEstimate(
            flops=int(flops),
            transcendentals=int(B_pad * out_dim_p),
            bytes_accessed=int(bytes_accessed),
        ),
    )(p_hat, *params)
    return out[:B, :out_dim]


def generator_forward_ref(p_hat, params):
    """Plain-JAX f32 reference (weights upcast from bf16) for correctness."""
    w1, b1, w2, b2, w3, b3, w4, b4 = [p.astype(jnp.float32) for p in params]
    h = p_hat.astype(jnp.bfloat16).astype(jnp.float32)  # kernel sees bf16 input
    h = jnp.maximum(h @ w1 + b1, 0.2 * (h @ w1 + b1))
    h = jnp.maximum(h @ w2 + b2, 0.2 * (h @ w2 + b2))
    h = jnp.maximum(h @ w3 + b3, 0.2 * (h @ w3 + b3))
    return jnp.tanh(h @ w4 + b4)


if __name__ == "__main__":
    latent_size = 32
    image_size = 16
    batch = 8

    key = jax.random.PRNGKey(0)
    key, kp, kx = jax.random.split(key, 3)

    params = init_generator_params(key, latent_size, image_size)
    p_hat = jax.random.normal(kp, (batch, latent_size), jnp.float32)
    # `x` is an unused argument in Generator.forward; included for fidelity.
    x = jax.random.normal(kx, (batch, image_size * image_size), jnp.float32)

    out = jax.block_until_ready(generator_forward(p_hat, params, image_size))
    ref = generator_forward_ref(p_hat, params)
    assert out.shape == (batch, image_size * image_size)
    assert jnp.allclose(out.astype(jnp.float32), ref, atol=3e-2, rtol=0.0), \
        "mismatch vs reference (small batch)"

    # Ragged, multi-tile batch: exercises the grid, low-waste padding, megacore
    # split and weight residency (TM becomes 104, pad only 12 rows).
    batch2 = 300
    p_hat2 = jax.random.normal(jax.random.PRNGKey(1), (batch2, latent_size), jnp.float32)
    out2 = jax.block_until_ready(generator_forward(p_hat2, params, image_size, tm=128))
    ref2 = generator_forward_ref(p_hat2, params)
    assert out2.shape == (batch2, image_size * image_size)
    assert jnp.allclose(out2.astype(jnp.float32), ref2, atol=3e-2, rtol=0.0), \
        "mismatch vs reference (gridded batch)"

    print("KERNEL_OK")
</pallas_src>

<mosaic_0001>
module attributes {stable_mosaic.version = 11 : i64} {
  func.func @generator_kernel(%arg0: i32, %arg1: memref<8x32xbf16, #tpu.memory_space<vmem>>, %arg2: memref<32x256xbf16, #tpu.memory_space<vmem>>, %arg3: memref<1x256xf32, #tpu.memory_space<vmem>>, %arg4: memref<256x512xbf16, #tpu.memory_space<vmem>>, %arg5: memref<1x512xf32, #tpu.memory_space<vmem>>, %arg6: memref<512x1024xbf16, #tpu.memory_space<vmem>>, %arg7: memref<1x1024xf32, #tpu.memory_space<vmem>>, %arg8: memref<1024x256xbf16, #tpu.memory_space<vmem>>, %arg9: memref<1x256xf32, #tpu.memory_space<vmem>>, %arg10: memref<8x256xbf16, #tpu.memory_space<vmem>>) attributes {dimension_semantics = [#tpu.dimension_semantics<parallel>], iteration_bounds = array<i64: 1>, scalar_prefetch = 0 : i64, scratch_operands = 0 : i64, tpu.core_type = #tpu.core_type<tc>, window_params = [{transform_indices = @transform_0, window_bounds = array<i64: 8, 32>}, {pipeline_mode = #tpu.pipeline_mode<synchronous>, transform_indices = @transform_1, window_bounds = array<i64: 32, 256>}, {pipeline_mode = #tpu.pipeline_mode<synchronous>, transform_indices = @transform_2, window_bounds = array<i64: 1, 256>}, {pipeline_mode = #tpu.pipeline_mode<synchronous>, transform_indices = @transform_3, window_bounds = array<i64: 256, 512>}, {pipeline_mode = #tpu.pipeline_mode<synchronous>, transform_indices = @transform_4, window_bounds = array<i64: 1, 512>}, {pipeline_mode = #tpu.pipeline_mode<synchronous>, transform_indices = @transform_5, window_bounds = array<i64: 512, 1024>}, {pipeline_mode = #tpu.pipeline_mode<synchronous>, transform_indices = @transform_6, window_bounds = array<i64: 1, 1024>}, {pipeline_mode = #tpu.pipeline_mode<synchronous>, transform_indices = @transform_7, window_bounds = array<i64: 1024, 256>}, {pipeline_mode = #tpu.pipeline_mode<synchronous>, transform_indices = @transform_8, window_bounds = array<i64: 1, 256>}, {transform_indices = @transform_9, window_bounds = array<i64: 8, 256>}]} {
    %c0 = arith.constant 0 : index
    %c0_0 = arith.constant 0 : index
    %0 = vector.load %arg1[%c0, %c0_0] : memref<8x32xbf16, #tpu.memory_space<vmem>>, vector<8x32xbf16>
    %c0_1 = arith.constant 0 : index
    %c0_2 = arith.constant 0 : index
    %1 = vector.load %arg2[%c0_1, %c0_2] : memref<32x256xbf16, #tpu.memory_space<vmem>>, vector<32x256xbf16>
    %cst = arith.constant dense<0.000000e+00> : vector<8x256xf32>
    %2 = tpu.matmul %0, %1, %cst {dimension_numbers = #tpu.dot_dimension_numbers<[1], [0], [0], [1], [0, 0, 1, 1], [], []>} : vector<8x32xbf16>, vector<32x256xbf16>, vector<8x256xf32> -> vector<8x256xf32>
    %c0_3 = arith.constant 0 : index
    %c0_4 = arith.constant 0 : index
    %3 = vector.load %arg3[%c0_3, %c0_4] : memref<1x256xf32, #tpu.memory_space<vmem>>, vector<1x256xf32>
    %4 = vector.broadcast %3 : vector<1x256xf32> to vector<8x256xf32>
    %5 = arith.addf %2, %4 : vector<8x256xf32>
    %cst_5 = arith.constant 2.000000e-01 : f32
    %6 = vector.broadcast %cst_5 : f32 to vector<8x256xf32>
    %7 = arith.mulf %6, %5 : vector<8x256xf32>
    %8 = arith.maximumf %5, %7 : vector<8x256xf32>
    %9 = arith.truncf %8 : vector<8x256xf32> to vector<8x256xbf16>
    %c0_6 = arith.constant 0 : index
    %c0_7 = arith.constant 0 : index
    %10 = vector.load %arg4[%c0_6, %c0_7] : memref<256x512xbf16, #tpu.memory_space<vmem>>, vector<256x512xbf16>
    %cst_8 = arith.constant dense<0.000000e+00> : vector<8x512xf32>
    %11 = tpu.matmul %9, %10, %cst_8 {dimension_numbers = #tpu.dot_dimension_numbers<[1], [0], [0], [1], [0, 0, 1, 1], [], []>} : vector<8x256xbf16>, vector<256x512xbf16>, vector<8x512xf32> -> vector<8x512xf32>
    %c0_9 = arith.constant 0 : index
    %c0_10 = arith.constant 0 : index
    %12 = vector.load %arg5[%c0_9, %c0_10] : memref<1x512xf32, #tpu.memory_space<vmem>>, vector<1x512xf32>
    %13 = vector.broadcast %12 : vector<1x512xf32> to vector<8x512xf32>
    %14 = arith.addf %11, %13 : vector<8x512xf32>
    %cst_11 = arith.constant 2.000000e-01 : f32
    %15 = vector.broadcast %cst_11 : f32 to vector<8x512xf32>
    %16 = arith.mulf %15, %14 : vector<8x512xf32>
    %17 = arith.maximumf %14, %16 : vector<8x512xf32>
    %18 = arith.truncf %17 : vector<8x512xf32> to vector<8x512xbf16>
    %c0_12 = arith.constant 0 : index
    %c0_13 = arith.constant 0 : index
    %19 = vector.load %arg6[%c0_12, %c0_13] : memref<512x1024xbf16, #tpu.memory_space<vmem>>, vector<512x1024xbf16>
    %cst_14 = arith.constant dense<0.000000e+00> : vector<8x1024xf32>
    %20 = tpu.matmul %18, %19, %cst_14 {dimension_numbers = #tpu.dot_dimension_numbers<[1], [0], [0], [1], [0, 0, 1, 1], [], []>} : vector<8x512xbf16>, vector<512x1024xbf16>, vector<8x1024xf32> -> vector<8x1024xf32>
    %c0_15 = arith.constant 0 : index
    %c0_16 = arith.constant 0 : index
    %21 = vector.load %arg7[%c0_15, %c0_16] : memref<1x1024xf32, #tpu.memory_space<vmem>>, vector<1x1024xf32>
    %22 = vector.broadcast %21 : vector<1x1024xf32> to vector<8x1024xf32>
    %23 = arith.addf %20, %22 : vector<8x1024xf32>
    %cst_17 = arith.constant 2.000000e-01 : f32
    %24 = vector.broadcast %cst_17 : f32 to vector<8x1024xf32>
    %25 = arith.mulf %24, %23 : vector<8x1024xf32>
    %26 = arith.maximumf %23, %25 : vector<8x1024xf32>
    %27 = arith.truncf %26 : vector<8x1024xf32> to vector<8x1024xbf16>
    %c0_18 = arith.constant 0 : index
    %c0_19 = arith.constant 0 : index
    %28 = vector.load %arg8[%c0_18, %c0_19] : memref<1024x256xbf16, #tpu.memory_space<vmem>>, vector<1024x256xbf16>
    %cst_20 = arith.constant dense<0.000000e+00> : vector<8x256xf32>
    %29 = tpu.matmul %27, %28, %cst_20 {dimension_numbers = #tpu.dot_dimension_numbers<[1], [0], [0], [1], [0, 0, 1, 1], [], []>} : vector<8x1024xbf16>, vector<1024x256xbf16>, vector<8x256xf32> -> vector<8x256xf32>
    %c0_21 = arith.constant 0 : index
    %c0_22 = arith.constant 0 : index
    %30 = vector.load %arg9[%c0_21, %c0_22] : memref<1x256xf32, #tpu.memory_space<vmem>>, vector<1x256xf32>
    %31 = vector.broadcast %30 : vector<1x256xf32> to vector<8x256xf32>
    %32 = arith.addf %29, %31 : vector<8x256xf32>
    %33 = math.tanh %32 : vector<8x256xf32>
    %34 = arith.truncf %33 : vector<8x256xf32> to vector<8x256xbf16>
    %c0_23 = arith.constant 0 : index
    %c0_24 = arith.constant 0 : index
    %35 = vector.load %arg10[%c0_23, %c0_24] : memref<8x256xbf16, #tpu.memory_space<vmem>>, vector<8x256xbf16>
    tpu.vector_store %arg10[%c0_23, %c0_24], %34 {strides = array<i32>} : memref<8x256xbf16, #tpu.memory_space<vmem>>, vector<8x256xbf16>,
    return
  }
  func.func @transform_0(%arg0: i32) -> (i32, i32) {
    %c0_i32 = arith.constant 0 : i32
    %c0_i32_0 = arith.constant 0 : i32
    return %arg0, %c0_i32 : i32, i32
  }
  func.func @transform_1(%arg0: i32) -> (i32, i32) {
    %c0_i32 = arith.constant 0 : i32
    %c0_i32_0 = arith.constant 0 : i32
    %c0_i32_1 = arith.constant 0 : i32
    return %c0_i32, %c0_i32_0 : i32, i32
  }
  func.func @transform_2(%arg0: i32) -> (i32, i32) {
    %c0_i32 = arith.constant 0 : i32
    %c0_i32_0 = arith.constant 0 : i32
    %c0_i32_1 = arith.constant 0 : i32
    return %c0_i32, %c0_i32_0 : i32, i32
  }
  func.func @transform_3(%arg0: i32) -> (i32, i32) {
    %c0_i32 = arith.constant 0 : i32
    %c0_i32_0 = arith.constant 0 : i32
    %c0_i32_1 = arith.constant 0 : i32
    return %c0_i32, %c0_i32_0 : i32, i32
  }
  func.func @transform_4(%arg0: i32) -> (i32, i32) {
    %c0_i32 = arith.constant 0 : i32
    %c0_i32_0 = arith.constant 0 : i32
    %c0_i32_1 = arith.constant 0 : i32
    return %c0_i32, %c0_i32_0 : i32, i32
  }
  func.func @transform_5(%arg0: i32) -> (i32, i32) {
    %c0_i32 = arith.constant 0 : i32
    %c0_i32_0 = arith.constant 0 : i32
    %c0_i32_1 = arith.constant 0 : i32
    return %c0_i32, %c0_i32_0 : i32, i32
  }
  func.func @transform_6(%arg0: i32) -> (i32, i32) {
    %c0_i32 = arith.constant 0 : i32
    %c0_i32_0 = arith.constant 0 : i32
    %c0_i32_1 = arith.constant 0 : i32
    return %c0_i32, %c0_i32_0 : i32, i32
  }
  func.func @transform_7(%arg0: i32) -> (i32, i32) {
    %c0_i32 = arith.constant 0 : i32
    %c0_i32_0 = arith.constant 0 : i32
    %c0_i32_1 = arith.constant 0 : i32
    return %c0_i32, %c0_i32_0 : i32, i32
  }
  func.func @transform_8(%arg0: i32) -> (i32, i32) {
    %c0_i32 = arith.constant 0 : i32
    %c0_i32_0 = arith.constant 0 : i32
    %c0_i32_1 = arith.constant 0 : i32
    return %c0_i32, %c0_i32_0 : i32, i32
  }
  func.func @transform_9(%arg0: i32) -> (i32, i32) {
    %c0_i32 = arith.constant 0 : i32
    %c0_i32_0 = arith.constant 0 : i32
    return %arg0, %c0_i32 : i32, i32
  }
}

</mosaic_0001>

<bundles_post_ra>
// kernel: generator_forward.1
= control target key start
LH: loop header
LB: loop body
LE: loop exit
PB: predicated region body
PF: predicated region fallthrough
CT: control target
= control target key end

     0   :  { %14 = vsyncpa [#allocation3], 0  ;;  %s4743_s0 = inlined_call_operand.vmem [shape: bf16[8,32], index: 0, kind: input, shape index: {}]   ;;  %s4744_s1 = inlined_call_operand.hbm [shape: bf16[32,256], index: 1, kind: input, shape index: {}]   ;;  %s4745_s2 = inlined_call_operand.vmem [shape: f32[1,256], index: 2, kind: input, shape index: {}]   ;;  %s4746_s3 = inlined_call_operand.hbm [shape: bf16[256,512], index: 3, kind: input, shape index: {}]   ;;  %s4747_s4 = inlined_call_operand.vmem [shape: f32[1,512], index: 4, kind: input, shape index: {}]   ;;  %s4748_s5 = inlined_call_operand.hbm [shape: bf16[512,1024], index: 5, kind: input, shape index: {}]   ;;  %s4749_s6 = inlined_call_operand.vmem [shape: f32[1,1024], index: 6, kind: input, shape index: {}]   ;;  %s4750_s7 = inlined_call_operand.hbm [shape: bf16[1024,256], index: 7, kind: input, shape index: {}]   ;;  %s4751_s8 = inlined_call_operand.vmem [shape: f32[1,256], index: 8, kind: input, shape index: {}]   ;;  %s4752_s9 = inlined_call_operand.hbm [shape: bf16[8,256], index: 9, kind: output, shape index: {}]  }
   0x1   :  { %15 = vsyncpa [#allocation6], 0 }
   0x2   :  { %16 = vsyncpa [#allocation9], 0 }
   0x3   :  { %17 = vsyncpa [#allocation4], 0  ;;  %s4498_s30 = smov [#allocation5]   ;;  %s4380_s13 = scalar_lea.hbm %s4746_s3, 8192 }
   0x4   :  { %s39_s10 = sshll.u32 %s4498_s30, 4  ;;  %p4381_p0 = scmp.ne.s32.totalorder %s4746_s3, %s4380_s13  ;;  %s40_s10 = int_to_ptr.vmem [resolvable:$true] %s39_s10 }
   0x5   :  { %p4384_p1 = scmp.lt.u32.totalorder %s4380_s13, %s4746_s3 }
   0x7   :  { %p4386_p2 = pnand %p4384_p1, %p4381_p0 }
   0x9   :  { %4389 = shalt.err (!%p4386_p2)
}
   0xa   :  { %s4390_s18 = scalar_lea.vmem %s40_s10, 8192  ;;  %p4395_p4 = scmp.lt.s32.totalorder %s40_s10, %s40_s10 }
   0xb   :  { %p4391_p3 = scmp.ne.s32.totalorder %s40_s10, %s4390_s18  ;;  %p4396_p5 = scmp.lt.s32.totalorder %s4390_s18, %s4390_s18 }
   0xd   :  { %p4397_p6 = por %p4396_p5, %p4395_p4 }
   0xf   :  { %p4398_p7 = pnand %p4397_p6, %p4391_p3 }
  0x11   :  { %4401 = shalt.err (!%p4398_p7)
}
  0x12   :  { %s4499_s19 = smov 256   ;;  %s4500_s20 = smov 16  }
  0x13   :  { %45 = dma.hbm_to_vmem [thread:$0]  %s4746_s3, 8192, %s40_s10, [#allocation6], %s4499_s19, %s4499_s19, %s4500_s20  }
  0x14   :  { %s4501_s23 = smov [#allocation2]   ;;  %s4402_s27 = scalar_lea.hbm %s4744_s1, 512 }
  0x15   :  { %s25_s24 = sshll.u32 %s4501_s23, 4  ;;  %p4403_p8 = scmp.ne.s32.totalorder %s4744_s1, %s4402_s27  ;;  %s26_s24 = int_to_ptr.vmem [resolvable:$true] %s25_s24 }
  0x16   :  { %p4406_p9 = scmp.lt.u32.totalorder %s4402_s27, %s4744_s1 }
  0x18   :  { %p4408_p10 = pnand %p4406_p9, %p4403_p8 }
  0x1a   :  { %4411 = shalt.err (!%p4408_p10)
}
  0x1b   :  { %s4412_s12 = scalar_lea.vmem %s26_s24, 512  ;;  %p4417_p12 = scmp.lt.s32.totalorder %s26_s24, %s26_s24 }
  0x1c   :  { %p4413_p11 = scmp.ne.s32.totalorder %s26_s24, %s4412_s12  ;;  %p4418_p13 = scmp.lt.s32.totalorder %s4412_s12, %s4412_s12 }
  0x1e   :  { %p4419_p0 = por %p4418_p13, %p4417_p12 }
  0x20   :  { %p4420_p1 = pnand %p4419_p0, %p4413_p11 }
  0x22   :  { %4423 = shalt.err (!%p4420_p1)
}
  0x23   :  { %s4502_s3 = smov 128   ;;  %s4503_s10 = smov 8  }
  0x24   :  { %31 = dma.hbm_to_vmem [thread:$0]  %s4744_s1, 512, %s26_s24, [#allocation3], %s4502_s3, %s4502_s3, %s4503_s10  }
  0x25   :  { %s4504_s15 = smov [#allocation7]   ;;  %s4424_s19 = scalar_lea.hbm %s4748_s5, 32768 }
  0x26   :  { %s53_s16 = sshll.u32 %s4504_s15, 4  ;;  %p4425_p2 = scmp.ne.s32.totalorder %s4748_s5, %s4424_s19  ;;  %s54_s16 = int_to_ptr.vmem [resolvable:$true] %s53_s16 }
  0x27   :  { %p4428_p3 = scmp.lt.u32.totalorder %s4424_s19, %s4748_s5 }
  0x29   :  { %p4430_p4 = pnand %p4428_p3, %p4425_p2 }
  0x2b   :  { %4433 = shalt.err (!%p4430_p4)
}
  0x2c   :  { %s4434_s25 = scalar_lea.vmem %s54_s16, 32768  ;;  %p4439_p6 = scmp.lt.s32.totalorder %s54_s16, %s54_s16 }
  0x2d   :  { %p4435_p5 = scmp.ne.s32.totalorder %s54_s16, %s4434_s25  ;;  %p4440_p7 = scmp.lt.s32.totalorder %s4434_s25, %s4434_s25 }
  0x2f   :  { %p4441_p8 = por %p4440_p7, %p4439_p6 }
  0x31   :  { %p4442_p9 = pnand %p4441_p8, %p4435_p5 }
  0x33   :  { %4445 = shalt.err (!%p4442_p9)
}
  0x34   :  { %s4505_s1 = smov 512   ;;  %s4506_s24 = smov 32  }
  0x35   :  { %59 = dma.hbm_to_vmem [thread:$0]  %s4748_s5, 32768, %s54_s16, [#allocation6], %s4505_s1, %s4505_s1, %s4506_s24  }
  0x36   :  { %s4507_s28 = smov [#allocation8]   ;;  %s4446_s12 = scalar_lea.hbm %s4750_s7, 16384 }
  0x37   :  { %s67_s29 = sshll.u32 %s4507_s28, 4  ;;  %p4447_p10 = scmp.ne.s32.totalorder %s4750_s7, %s4446_s12  ;;  %s68_s29 = int_to_ptr.vmem [resolvable:$true] %s67_s29 }
  0x38   :  { %p4450_p11 = scmp.lt.u32.totalorder %s4446_s12, %s4750_s7 }
  0x3a   :  { %p4452_p12 = pnand %p4450_p11, %p4447_p10 }
  0x3c   :  { %4455 = shalt.err (!%p4452_p12)
}
  0x3d   :  { %s4456_s18 = scalar_lea.vmem %s68_s29, 16384  ;;  %p4461_p0 = scmp.lt.s32.totalorder %s68_s29, %s68_s29 }
  0x3e   :  { %p4457_p13 = scmp.ne.s32.totalorder %s68_s29, %s4456_s18  ;;  %p4462_p1 = scmp.lt.s32.totalorder %s4456_s18, %s4456_s18 }
  0x40   :  { %p4463_p2 = por %p4462_p1, %p4461_p0 }
  0x42   :  { %p4464_p3 = pnand %p4463_p2, %p4457_p13 }
  0x44   :  { %4467 = shalt.err (!%p4464_p3)
}
  0x45   :  { %73 = dma.hbm_to_vmem [thread:$0]  %s4750_s7, 16384, %s68_s29, [#allocation9], %s4502_s3, %s4502_s3, %s4503_s10  }
  0x46   :  { %4490 = dma.done.wait [#allocation3], 512  }
  0x47   :  { %4491 = vsyncadd [#allocation3], 4294966784 }
  0x48   :  { %4492 = dma.done.wait [#allocation6], 40960  }
  0x49   :  { %4493 = vsyncadd [#allocation6], 4294926336 }
  0x4a   :  { %4494 = dma.done.wait [#allocation9], 16384  }
  0x4b   :  { %4495 = vsyncadd [#allocation9], 4294950912  ;;  %v4508_v0 = vmov 0   ;;  %v4082_v1 = vld [vmem:[#allocation2 + $0x4] ss:$8 sps:$4 sm:$0xff]   ;;  %vm126_vm0 = vcmask 261120   ;;  %v96_v39 = vlaneseq }
  0x4c   :  { %162 = vmatprep.mubr.bf16.mxu0 %v4508_v0  ;;  %v4084_v2 = vld [vmem:[#allocation2] ss:$8 sps:$4 sm:$0xff]   ;;  %130 = vmatprep.subr.bf16.mxu0 %v4082_v1  ;;  %v4085_v3 = vld [vmem:[#allocation2 + $0x14] ss:$8 sps:$4 sm:$0xff]   ;;  %v4087_v4 = vld [vmem:[#allocation2 + $0x10] ss:$8 sps:$4 sm:$0xff]  }
  0x4d   :  { %131 = vmatpush1.bf16.msra.mxu0 %v4084_v2  ;;  %v4090_v5 = vld [vmem:[#allocation5 + $0x4] ss:$16 sps:$4 sm:$0xff]   ;;  %v89_v6 = vld [vmem:[%s4743_s0] sm:$0xf]  ;;  %v4138_v38 = vld [vmem:[#allocation5 + $0xc] ss:$16 sps:$4 sm:$0xff]  }
  0x4e   :  { %132 = vmatprep.subr.bf16.mxu0 %v4085_v3  ;;  %v4088_v7 = vld [vmem:[#allocation5] ss:$16 sps:$4 sm:$0xff]   ;;  %v4093_v8 = vld [vmem:[#allocation5 + $0x24] ss:$16 sps:$4 sm:$0xff]   ;;  %v4617_v40 = vshrl.u32 %v96_v39, 7  ;;  %s4509_s22 = smov [#allocation10]  }
  0x4f   :  { %v4091_v9 = vld [vmem:[#allocation5 + $0x20] ss:$16 sps:$4 sm:$0xff]   ;;  %v4096_v10 = vld [vmem:[#allocation5 + $0x44] ss:$16 sps:$4 sm:$0xff]   ;;  %v4136_v57 = vld [vmem:[#allocation5 + $0x8] ss:$16 sps:$4 sm:$0xff]  }
  0x50   :  { %v4094_v11 = vld [vmem:[#allocation5 + $0x40] ss:$16 sps:$4 sm:$0xff]   ;;  %v4099_v12 = vld [vmem:[#allocation5 + $0x64] ss:$16 sps:$4 sm:$0xff]   ;;  %v4620_v41 = vsub.s32 0, %v4617_v40  ;;  %v4626_v43 = vsub.s32 1, %v4617_v40 }
  0x51   :  { %133 = vmatpush1.bf16.msra.mxu0 %v4087_v4  ;;  %v4097_v13 = vld [vmem:[#allocation5 + $0x60] ss:$16 sps:$4 sm:$0xff]   ;;  %v4102_v14 = vld [vmem:[#allocation5 + $0x84] ss:$16 sps:$4 sm:$0xff]   ;;  %v4141_v59 = vld [vmem:[#allocation5 + $0x2c] ss:$16 sps:$4 sm:$0xff]  }
  0x52   :  { %583 = vmatprep.subr.bf16.mxu0 %v4090_v5  ;;  %v4100_v15 = vld [vmem:[#allocation5 + $0x80] ss:$16 sps:$4 sm:$0xff]   ;;  %v4105_v16 = vld [vmem:[#allocation5 + $0xa4] ss:$16 sps:$4 sm:$0xff]   ;;  %v4139_v60 = vld [vmem:[#allocation5 + $0x28] ss:$16 sps:$4 sm:$0xff]  }
  0x53   :  { %v4103_v17 = vld [vmem:[#allocation5 + $0xa0] ss:$16 sps:$4 sm:$0xff]   ;;  %v4108_v18 = vld [vmem:[#allocation5 + $0xc4] ss:$16 sps:$4 sm:$0xff]   ;;  %v4144_v61 = vld [vmem:[#allocation5 + $0x4c] ss:$16 sps:$4 sm:$0xff]  }
  0x54   :  { %3583 = vmatmul.mubr.msk.bf16.vlgmr.msra.gmra.mrb[0].mxu0 %vm126_vm0, %v89_v6  ;;  %v4106_v19 = vld [vmem:[#allocation5 + $0xc0] ss:$16 sps:$4 sm:$0xff]   ;;  %v4111_v20 = vld [vmem:[#allocation5 + $0xe4] ss:$16 sps:$4 sm:$0xff]   ;;  %v4142_v62 = vld [vmem:[#allocation5 + $0x48] ss:$16 sps:$4 sm:$0xff]  }
  0x55   :  { %584 = vmatpush1.bf16.msra.mxu0 %v4088_v7  ;;  %v4109_v21 = vld [vmem:[#allocation5 + $0xe0] ss:$16 sps:$4 sm:$0xff]   ;;  %v4114_v22 = vld [vmem:[#allocation5 + $0x104] ss:$16 sps:$4 sm:$0xff]   ;;  %v4147_v63 = vld [vmem:[#allocation5 + $0x6c] ss:$16 sps:$4 sm:$0xff]  }
  0x56   :  { %585 = vmatprep.subr.bf16.mxu0 %v4093_v8  ;;  %v4112_v23 = vld [vmem:[#allocation5 + $0x100] ss:$16 sps:$4 sm:$0xff]   ;;  %v4117_v24 = vld [vmem:[#allocation5 + $0x124] ss:$16 sps:$4 sm:$0xff]   ;;  %v4145_v0 = vld [vmem:[#allocation5 + $0x68] ss:$16 sps:$4 sm:$0xff]  }
  0x57   :  { %v4115_v25 = vld [vmem:[#allocation5 + $0x120] ss:$16 sps:$4 sm:$0xff]   ;;  %v4120_v26 = vld [vmem:[#allocation5 + $0x144] ss:$16 sps:$4 sm:$0xff]   ;;  %v4150_v1 = vld [vmem:[#allocation5 + $0x8c] ss:$16 sps:$4 sm:$0xff]  }
  0x58   :  { %v4118_v27 = vld [vmem:[#allocation5 + $0x140] ss:$16 sps:$4 sm:$0xff]   ;;  %v4123_v28 = vld [vmem:[#allocation5 + $0x164] ss:$16 sps:$4 sm:$0xff]   ;;  %v4148_v2 = vld [vmem:[#allocation5 + $0x88] ss:$16 sps:$4 sm:$0xff]  }
  0x59   :  { %586 = vmatpush1.bf16.msra.mxu0 %v4091_v9  ;;  %v4121_v29 = vld [vmem:[#allocation5 + $0x160] ss:$16 sps:$4 sm:$0xff]   ;;  %v4126_v30 = vld [vmem:[#allocation5 + $0x184] ss:$16 sps:$4 sm:$0xff]   ;;  %v4153_v3 = vld [vmem:[#allocation5 + $0xac] ss:$16 sps:$4 sm:$0xff]  }
  0x5a   :  { %587 = vmatprep.subr.bf16.mxu0 %v4096_v10  ;;  %v4124_v31 = vld [vmem:[#allocation5 + $0x180] ss:$16 sps:$4 sm:$0xff]   ;;  %v4129_v32 = vld [vmem:[#allocation5 + $0x1a4] ss:$16 sps:$4 sm:$0xff]   ;;  %v4151_v4 = vld [vmem:[#allocation5 + $0xa8] ss:$16 sps:$4 sm:$0xff]  }
  0x5b   :  { %v4127_v33 = vld [vmem:[#allocation5 + $0x1a0] ss:$16 sps:$4 sm:$0xff]   ;;  %v4132_v34 = vld [vmem:[#allocation5 + $0x1c4] ss:$16 sps:$4 sm:$0xff]   ;;  %v4156_v5 = vld [vmem:[#allocation5 + $0xcc] ss:$16 sps:$4 sm:$0xff]  }
  0x5c   :  { %v4130_v35 = vld [vmem:[#allocation5 + $0x1c0] ss:$16 sps:$4 sm:$0xff]   ;;  %v4135_v36 = vld [vmem:[#allocation5 + $0x1e4] ss:$16 sps:$4 sm:$0xff]   ;;  %v4154_v6 = vld [vmem:[#allocation5 + $0xc8] ss:$16 sps:$4 sm:$0xff]  }
  0x5d   :  { %588 = vmatpush1.bf16.msra.mxu0 %v4094_v11  ;;  %v4133_v37 = vld [vmem:[#allocation5 + $0x1e0] ss:$16 sps:$4 sm:$0xff]   ;;  %v4159_v7 = vld [vmem:[#allocation5 + $0xec] ss:$16 sps:$4 sm:$0xff]   ;;  %v4157_v8 = vld [vmem:[#allocation5 + $0xe8] ss:$16 sps:$4 sm:$0xff]  }
  0x5e   :  { %589 = vmatprep.subr.bf16.mxu0 %v4099_v12  ;;  %v94_v42 = vld [vmem:[%s4745_s2] sm:$0x3]  ;;  %v4162_v9 = vld [vmem:[#allocation5 + $0x10c] ss:$16 sps:$4 sm:$0xff]   ;;  %v4160_v10 = vld [vmem:[#allocation5 + $0x108] ss:$16 sps:$4 sm:$0xff]  }
  0x5f   :  { %v99_v44 = vrot.slane %v94_v42, %v4620_v41  ;;  %v103_v45 = vrot.slane %v94_v42, %v4626_v43  ;;  %v4165_v11 = vld [vmem:[#allocation5 + $0x12c] ss:$16 sps:$4 sm:$0xff]   ;;  %v4163_v12 = vld [vmem:[#allocation5 + $0x128] ss:$16 sps:$4 sm:$0xff]   ;;  %v709_v42 = vld [vmem:[#allocation7 + $0x100] sm:$0xff]  ;;  %s3568_s23 = sshll.u32 %s4509_s22, 4  ;;  %s3569_s23 = int_to_ptr.vmem [resolvable:$true] %s3568_s23 }
  0x60   :  { %p4473_p5 = scmp.lt.s32.totalorder %s3569_s23, %s3569_s23 }
  0x61   :  { %590 = vmatpush1.bf16.msra.mxu0 %v4097_v13  ;;  %v4168_v13 = vld [vmem:[#allocation5 + $0x14c] ss:$16 sps:$4 sm:$0xff]  }
  0x62   :  { %591 = vmatprep.subr.bf16.mxu0 %v4102_v14  ;;  %v4166_v14 = vld [vmem:[#allocation5 + $0x148] ss:$16 sps:$4 sm:$0xff]  }
  0x65   :  { %592 = vmatpush1.bf16.msra.mxu0 %v4100_v15  ;;  %v4171_v15 = vld [vmem:[#allocation5 + $0x16c] ss:$16 sps:$4 sm:$0xff]  }
  0x66   :  { %593 = vmatprep.subr.bf16.mxu0 %v4105_v16  ;;  %v4169_v16 = vld [vmem:[#allocation5 + $0x168] ss:$16 sps:$4 sm:$0xff]  }
  0x69   :  { %594 = vmatpush1.bf16.msra.mxu0 %v4103_v17  ;;  %v4174_v17 = vld [vmem:[#allocation5 + $0x18c] ss:$16 sps:$4 sm:$0xff]  }
  0x6a   :  { %595 = vmatprep.subr.bf16.mxu0 %v4108_v18  ;;  %v4172_v18 = vld [vmem:[#allocation5 + $0x188] ss:$16 sps:$4 sm:$0xff]  }
  0x6d   :  { %596 = vmatpush1.bf16.msra.mxu0 %v4106_v19  ;;  %v4177_v19 = vld [vmem:[#allocation5 + $0x1ac] ss:$16 sps:$4 sm:$0xff]  }
  0x6e   :  { %597 = vmatprep.subr.bf16.mxu0 %v4111_v20  ;;  %v4175_v20 = vld [vmem:[#allocation5 + $0x1a8] ss:$16 sps:$4 sm:$0xff]  }
  0x71   :  { %598 = vmatpush1.bf16.msra.mxu0 %v4109_v21  ;;  %v4180_v21 = vld [vmem:[#allocation5 + $0x1cc] ss:$16 sps:$4 sm:$0xff]  }
  0x72   :  { %599 = vmatprep.subr.bf16.mxu0 %v4114_v22  ;;  %v4178_v22 = vld [vmem:[#allocation5 + $0x1c8] ss:$16 sps:$4 sm:$0xff]  }
  0x75   :  { %600 = vmatpush1.bf16.msra.mxu0 %v4112_v23  ;;  %v4183_v23 = vld [vmem:[#allocation5 + $0x1ec] ss:$16 sps:$4 sm:$0xff]  }
  0x76   :  { %601 = vmatprep.subr.bf16.mxu0 %v4117_v24  ;;  %v677_v24 = vld [vmem:[#allocation7] sm:$0xff] }
  0x79   :  { %602 = vmatpush1.bf16.msra.mxu0 %v4115_v25  ;;  %v681_v25 = vld [vmem:[#allocation7 + $0x20] sm:$0xff] }
  0x7a   :  { %603 = vmatprep.subr.bf16.mxu0 %v4120_v26  ;;  %v4181_v26 = vld [vmem:[#allocation5 + $0x1e8] ss:$16 sps:$4 sm:$0xff]  }
  0x7d   :  { %604 = vmatpush1.bf16.msra.mxu0 %v4118_v27  ;;  %v3649_v27 = vcombine.high %v677_v24, %v681_v25 }
  0x7e   :  { %605 = vmatprep.subr.bf16.mxu0 %v4123_v28  ;;  %v685_v28 = vld [vmem:[#allocation7 + $0x40] sm:$0xff] }
  0x81   :  { %606 = vmatpush1.bf16.msra.mxu0 %v4121_v29  ;;  %v689_v29 = vld [vmem:[#allocation7 + $0x60] sm:$0xff] }
  0x82   :  { %607 = vmatprep.subr.bf16.mxu0 %v4126_v30  ;;  %v3648_v30 = vcombine.low %v677_v24, %v681_v25 }
  0x85   :  { %608 = vmatpush1.bf16.msra.mxu0 %v4124_v31  ;;  %v3657_v31 = vcombine.high %v685_v28, %v689_v29 }
  0x86   :  { %609 = vmatprep.subr.bf16.mxu0 %v4129_v32  ;;  %v693_v32 = vld [vmem:[#allocation7 + $0x80] sm:$0xff] }
  0x89   :  { %610 = vmatpush1.bf16.msra.mxu0 %v4127_v33  ;;  %v697_v33 = vld [vmem:[#allocation7 + $0xa0] sm:$0xff] }
  0x8a   :  { %611 = vmatprep.subr.bf16.mxu0 %v4132_v34  ;;  %v3656_v34 = vcombine.low %v685_v28, %v689_v29  ;;  %v773_v28 = vld [vmem:[#allocation7 + $0x300] sm:$0xff] }
  0x8b   :  { %v777_v29 = vld [vmem:[#allocation7 + $0x320] sm:$0xff] }
  0x8d   :  { %612 = vmatpush1.bf16.msra.mxu0 %v4130_v35  ;;  %v3665_v35 = vcombine.high %v693_v32, %v697_v33 }
  0x8e   :  { %613 = vmatprep.subr.bf16.mxu0 %v4135_v36  ;;  %v701_v36 = vld [vmem:[#allocation7 + $0xc0] sm:$0xff] }
  0x91   :  { %614 = vmatpush1.bf16.msra.mxu0 %v4133_v37  ;;  %v705_v37 = vld [vmem:[#allocation7 + $0xe0] sm:$0xff] }
  0x92   :  { %624 = vmatprep.subr.bf16.mxu0 %v4138_v38  ;;  %v3664_v38 = vcombine.low %v693_v32, %v697_v33  ;;  %v3673_v39 = vcombine.high %v701_v36, %v705_v37  ;;  %v3745_v33 = vcombine.high %v773_v28, %v777_v29 }
 0x127   :  { %v164_v46 = vpop.f32.mrb[0].mxu0 }
 0x128   :  { %v165_v47 = vadd.f32 %v164_v46, %v99_v44  ;;  %v166_v48 = vpop.f32.mrb[1].mxu0  ;;  %v713_v44 = vld [vmem:[#allocation7 + $0x120] sm:$0xff] }
 0x129   :  { %v167_v49 = vadd.f32 %v166_v48, %v103_v45  ;;  %v168_v50 = vpop.f32.mrb[2].mxu0  ;;  %v3672_v45 = vcombine.low %v701_v36, %v705_v37  ;;  %v3681_v46 = vcombine.high %v709_v42, %v713_v44  ;;  %v721_v48 = vld [vmem:[#allocation7 + $0x160] sm:$0xff] }
 0x12a   :  { %v171_v51 = vmul.f32 0.2, %v165_v47  ;;  %v169_v52 = vpop.f32.mrb[3].mxu0  ;;  %v781_v36 = vld [vmem:[#allocation7 + $0x340] sm:$0xff] }
 0x12b   :  { %v172_v53 = vmul.f32 0.2, %v167_v49  ;;  %v729_v52 = vld [vmem:[#allocation7 + $0x1a0] sm:$0xff] }
 0x12c   :  { %v173_v54 = vmax.f32 %v165_v47, %v171_v51  ;;  %v717_v47 = vld [vmem:[#allocation7 + $0x140] sm:$0xff] }
 0x12d   :  { %v174_v55 = vmax.f32 %v167_v49, %v172_v53  ;;  %v3680_v49 = vcombine.low %v709_v42, %v713_v44  ;;  %v3689_v50 = vcombine.high %v717_v47, %v721_v48  ;;  %v725_v51 = vld [vmem:[#allocation7 + $0x180] sm:$0xff]  ;;  %v3688_v53 = vcombine.low %v717_v47, %v721_v48 }
 0x12e   :  { %v4630_v58 = vpack.c.bf16 %v173_v54, %v173_v54  ;;  %v3697_v54 = vcombine.high %v725_v51, %v729_v52  ;;  %v785_v37 = vld [vmem:[#allocation7 + $0x360] sm:$0xff]  ;;  %v3744_v42 = vcombine.low %v773_v28, %v777_v29 }
 0x12f   :  { %v176_v56 = vpack.c.bf16 %v174_v55, %v174_v55  ;;  %v733_v55 = vld [vmem:[#allocation7 + $0x1c0] sm:$0xff]  ;;  %v3753_v44 = vcombine.high %v781_v36, %v785_v37 }
 0x130   :  { %v789_v47 = vld [vmem:[#allocation7 + $0x380] sm:$0xff] }
 0x131   :  { %615 = vmatprep.mubr.bf16.mxu0 %v176_v56  ;;  %v793_v48 = vld [vmem:[#allocation7 + $0x3a0] sm:$0xff] }
 0x132   :  { %616 = vmatmul.mubr.bf16.vlgmr.msra.gmra.mrb[4].mxu0 %v4630_v58 }
 0x133   :  { %625 = vmatpush1.bf16.msra.mxu0 %v4136_v57  ;;  %656 = vmatprep.mubr.bf16.mxu0 %v176_v56  ;;  %v737_v56 = vld [vmem:[#allocation7 + $0x1e0] sm:$0xff]  ;;  %v3696_v57 = vcombine.low %v725_v51, %v729_v52  ;;  %v3752_v51 = vcombine.low %v781_v36, %v785_v37  ;;  %v3761_v52 = vcombine.high %v789_v47, %v793_v48 }
 0x134   :  { %626 = vmatprep.subr.bf16.mxu0 %v4141_v59  ;;  %v741_v59 = vld [vmem:[#allocation7 + $0x200] sm:$0xff] }
 0x137   :  { %627 = vmatpush1.bf16.msra.mxu0 %v4139_v60  ;;  %v745_v60 = vld [vmem:[#allocation7 + $0x220] sm:$0xff] }
 0x138   :  { %628 = vmatprep.subr.bf16.mxu0 %v4144_v61  ;;  %v3704_v61 = vcombine.low %v733_v55, %v737_v56 }
 0x13b   :  { %629 = vmatpush1.bf16.msra.mxu0 %v4142_v62  ;;  %v3713_v62 = vcombine.high %v741_v59, %v745_v60 }
 0x13c   :  { %630 = vmatprep.subr.bf16.mxu0 %v4147_v63  ;;  %v749_v63 = vld [vmem:[#allocation7 + $0x240] sm:$0xff] }
 0x13f   :  { %631 = vmatpush1.bf16.msra.mxu0 %v4145_v0  ;;  %v805_v0 = vld [vmem:[#allocation7 + $0x400] sm:$0xff] }
 0x140   :  { %632 = vmatprep.subr.bf16.mxu0 %v4150_v1  ;;  %v809_v1 = vld [vmem:[#allocation7 + $0x420] sm:$0xff] }
 0x143   :  { %633 = vmatpush1.bf16.msra.mxu0 %v4148_v2  ;;  %v753_v2 = vld [vmem:[#allocation7 + $0x260] sm:$0xff] }
 0x144   :  { %634 = vmatprep.subr.bf16.mxu0 %v4153_v3  ;;  %v3777_v3 = vcombine.high %v805_v0, %v809_v1 }
 0x146   :  { %2296 = vmatprep.subr.bf16.mxu1 %v3777_v3  ;;  %v869_v3 = vld [vmem:[#allocation7 + $0x600] sm:$0xff] }
 0x147   :  { %635 = vmatpush1.bf16.msra.mxu0 %v4151_v4  ;;  %v4634_v4 = vld [vmem:[#allocation7 + $0x8] sm:$0xff] }
 0x148   :  { %636 = vmatprep.subr.bf16.mxu0 %v4156_v5  ;;  %v4636_v5 = vld [vmem:[#allocation7 + $0x28] sm:$0xff] }
 0x14b   :  { %637 = vmatpush1.bf16.msra.mxu0 %v4154_v6  ;;  %v3776_v6 = vcombine.low %v805_v0, %v809_v1 }
 0x14c   :  { %638 = vmatprep.subr.bf16.mxu0 %v4159_v7  ;;  %v3712_v7 = vcombine.low %v741_v59, %v745_v60  ;;  %v3760_v59 = vcombine.low %v789_v47, %v793_v48 }
 0x14d   :  { %2297 = vmatpush1.bf16.msra.mxu1 %v3776_v6  ;;  %v873_v6 = vld [vmem:[#allocation7 + $0x620] sm:$0xff] }
 0x14f   :  { %639 = vmatpush1.bf16.msra.mxu0 %v4157_v8  ;;  %v3650_v8 = vcombine.low %v4634_v4, %v4636_v5 }
 0x150   :  { %640 = vmatprep.subr.bf16.mxu0 %v4162_v9  ;;  %v3721_v9 = vcombine.high %v749_v63, %v753_v2 }
 0x153   :  { %641 = vmatpush1.bf16.msra.mxu0 %v4160_v10  ;;  %v813_v10 = vld [vmem:[#allocation7 + $0x440] sm:$0xff] }
 0x154   :  { %642 = vmatprep.subr.bf16.mxu0 %v4165_v11  ;;  %v817_v11 = vld [vmem:[#allocation7 + $0x460] sm:$0xff] }
 0x157   :  { %643 = vmatpush1.bf16.msra.mxu0 %v4163_v12  ;;  %v757_v12 = vld [vmem:[#allocation7 + $0x280] sm:$0xff] }
 0x158   :  { %644 = vmatprep.subr.bf16.mxu0 %v4168_v13  ;;  %v761_v13 = vld [vmem:[#allocation7 + $0x2a0] sm:$0xff] }
 0x159   :  { %v3728_v24 = vcombine.low %v757_v12, %v761_v13 }
 0x15b   :  { %645 = vmatpush1.bf16.msra.mxu0 %v4166_v14  ;;  %v3785_v14 = vcombine.high %v813_v10, %v817_v11 }
 0x15c   :  { %646 = vmatprep.subr.bf16.mxu0 %v4171_v15  ;;  %v3784_v15 = vcombine.low %v813_v10, %v817_v11  ;;  %v877_v10 = vld [vmem:[#allocation7 + $0x640] sm:$0xff] }
 0x15d   :  { %2298 = vmatprep.subr.bf16.mxu1 %v3785_v14  ;;  %v881_v11 = vld [vmem:[#allocation7 + $0x660] sm:$0xff] }
 0x15e   :  { %2299 = vmatpush1.bf16.msra.mxu1 %v3784_v15  ;;  %v885_v14 = vld [vmem:[#allocation7 + $0x680] sm:$0xff] }
 0x15f   :  { %647 = vmatpush1.bf16.msra.mxu0 %v4169_v16  ;;  %v3720_v16 = vcombine.low %v749_v63, %v753_v2  ;;  %v3651_v2 = vcombine.high %v4634_v4, %v4636_v5  ;;  %v889_v15 = vld [vmem:[#allocation7 + $0x6a0] sm:$0xff]  ;;  %v722_v4 = vld [vmem:[#allocation7 + $0x168] sm:$0xff] }
 0x160   :  { %648 = vmatprep.subr.bf16.mxu0 %v4174_v17  ;;  %v3729_v17 = vcombine.high %v757_v12, %v761_v13  ;;  %v3849_v12 = vcombine.high %v877_v10, %v881_v11  ;;  %v3848_v13 = vcombine.low %v877_v10, %v881_v11  ;;  %v710_v10 = vld [vmem:[#allocation7 + $0x108] sm:$0xff] }
 0x161   :  { %v714_v11 = vld [vmem:[#allocation7 + $0x128] sm:$0xff] }
 0x162   :  { %v3682_v5 = vcombine.low %v710_v10, %v714_v11 }
 0x163   :  { %649 = vmatpush1.bf16.msra.mxu0 %v4172_v18  ;;  %v821_v18 = vld [vmem:[#allocation7 + $0x480] sm:$0xff] }
 0x164   :  { %650 = vmatprep.subr.bf16.mxu0 %v4177_v19  ;;  %v825_v19 = vld [vmem:[#allocation7 + $0x4a0] sm:$0xff] }
 0x167   :  { %651 = vmatpush1.bf16.msra.mxu0 %v4175_v20  ;;  %v765_v20 = vld [vmem:[#allocation7 + $0x2c0] sm:$0xff] }
 0x168   :  { %652 = vmatprep.subr.bf16.mxu0 %v4180_v21  ;;  %v769_v21 = vld [vmem:[#allocation7 + $0x2e0] sm:$0xff] }
 0x169   :  { %v3737_v25 = vcombine.high %v765_v20, %v769_v21  ;;  %v3736_v32 = vcombine.low %v765_v20, %v769_v21 }
 0x16b   :  { %653 = vmatpush1.bf16.msra.mxu0 %v4178_v22  ;;  %v3793_v22 = vcombine.high %v821_v18, %v825_v19 }
 0x16c   :  { %654 = vmatprep.subr.bf16.mxu0 %v4183_v23  ;;  %v3792_v23 = vcombine.low %v821_v18, %v825_v19  ;;  %v893_v18 = vld [vmem:[#allocation7 + $0x6c0] sm:$0xff] }
 0x16d   :  { %2300 = vmatprep.subr.bf16.mxu1 %v3793_v22  ;;  %v897_v19 = vld [vmem:[#allocation7 + $0x6e0] sm:$0xff] }
 0x16e   :  { %2301 = vmatpush1.bf16.msra.mxu1 %v3792_v23  ;;  %v3865_v20 = vcombine.high %v893_v18, %v897_v19  ;;  %v3864_v21 = vcombine.low %v893_v18, %v897_v19  ;;  %v901_v22 = vld [vmem:[#allocation7 + $0x700] sm:$0xff]  ;;  %v734_v19 = vld [vmem:[#allocation7 + $0x1c8] sm:$0xff] }
 0x16f   :  { %655 = vmatpush1.bf16.msra.mxu0 %v4181_v26  ;;  %v829_v26 = vld [vmem:[#allocation7 + $0x4c0] sm:$0xff] }
 0x170   :  { %2255 = vmatprep.subr.bf16.mxu0 %v3649_v27  ;;  %v833_v27 = vld [vmem:[#allocation7 + $0x4e0] sm:$0xff] }
 0x171   :  { %v905_v23 = vld [vmem:[#allocation7 + $0x720] sm:$0xff] }
 0x172   :  { %657 = vmatmul.mubr.bf16.vlgmr.msra.gmra.mrb[8].mxu0 %v4630_v58  ;;  %v3705_v58 = vcombine.high %v733_v55, %v737_v56  ;;  %v797_v55 = vld [vmem:[#allocation7 + $0x3c0] sm:$0xff] }
 0x173   :  { %2256 = vmatpush1.bf16.msra.mxu0 %v3648_v30  ;;  %v3801_v30 = vcombine.high %v829_v26, %v833_v27  ;;  %v801_v56 = vld [vmem:[#allocation7 + $0x3e0] sm:$0xff] }
 0x174   :  { %2257 = vmatprep.subr.bf16.mxu0 %v3657_v31  ;;  %v3800_v31 = vcombine.low %v829_v26, %v833_v27  ;;  %v3769_v60 = vcombine.high %v797_v55, %v801_v56  ;;  %v3768_v1 = vcombine.low %v797_v55, %v801_v56  ;;  %v909_v26 = vld [vmem:[#allocation7 + $0x740] sm:$0xff] }
 0x175   :  { %2302 = vmatprep.subr.bf16.mxu1 %v3801_v30  ;;  %v913_v27 = vld [vmem:[#allocation7 + $0x760] sm:$0xff] }
 0x176   :  { %2303 = vmatpush1.bf16.msra.mxu1 %v3800_v31  ;;  %v3881_v28 = vcombine.high %v909_v26, %v913_v27  ;;  %v3880_v29 = vcombine.low %v909_v26, %v913_v27  ;;  %v917_v30 = vld [vmem:[#allocation7 + $0x780] sm:$0xff]  ;;  %v750_v27 = vld [vmem:[#allocation7 + $0x248] sm:$0xff] }
 0x177   :  { %2258 = vmatpush1.bf16.msra.mxu0 %v3656_v34  ;;  %v837_v34 = vld [vmem:[#allocation7 + $0x500] sm:$0xff] }
 0x178   :  { %2259 = vmatprep.subr.bf16.mxu0 %v3665_v35  ;;  %v841_v35 = vld [vmem:[#allocation7 + $0x520] sm:$0xff] }
 0x179   :  { %v921_v31 = vld [vmem:[#allocation7 + $0x7a0] sm:$0xff] }
 0x17b   :  { %2260 = vmatpush1.bf16.msra.mxu0 %v3664_v38  ;;  %v3809_v38 = vcombine.high %v837_v34, %v841_v35 }
 0x17c   :  { %2261 = vmatprep.subr.bf16.mxu0 %v3673_v39  ;;  %v3808_v39 = vcombine.low %v837_v34, %v841_v35  ;;  %v925_v34 = vld [vmem:[#allocation7 + $0x7c0] sm:$0xff] }
 0x17d   :  { %2304 = vmatprep.subr.bf16.mxu1 %v3809_v38  ;;  %v929_v35 = vld [vmem:[#allocation7 + $0x7e0] sm:$0xff]  ;;  %v4642_v38 = vld [vmem:[#allocation7 + $0x10] sm:$0xff] }
 0x17e   :  { %2305 = vmatpush1.bf16.msra.mxu1 %v3808_v39  ;;  %v3897_v36 = vcombine.high %v925_v34, %v929_v35  ;;  %v3896_v37 = vcombine.low %v925_v34, %v929_v35  ;;  %v4644_v39 = vld [vmem:[#allocation7 + $0x30] sm:$0xff]  ;;  %v766_v35 = vld [vmem:[#allocation7 + $0x2c8] sm:$0xff] }
 0x17f   :  { %2262 = vmatpush1.bf16.msra.mxu0 %v3672_v45  ;;  %v845_v45 = vld [vmem:[#allocation7 + $0x540] sm:$0xff] }
 0x180   :  { %2263 = vmatprep.subr.bf16.mxu0 %v3681_v46  ;;  %v849_v46 = vld [vmem:[#allocation7 + $0x560] sm:$0xff] }
 0x183   :  { %2264 = vmatpush1.bf16.msra.mxu0 %v3680_v49  ;;  %v3817_v49 = vcombine.high %v845_v45, %v849_v46 }
 0x184   :  { %2265 = vmatprep.subr.bf16.mxu0 %v3689_v50  ;;  %v3816_v50 = vcombine.low %v845_v45, %v849_v46  ;;  %v4653_v45 = vld [vmem:[%s4747_s4] sm:$0xf] }
 0x185   :  { %2306 = vmatprep.subr.bf16.mxu1 %v3817_v49  ;;  %v246_v46 = vrot.slane %v4653_v45, %v4620_v41  ;;  %v250_v47 = vrot.slane %v4653_v45, %v4626_v43 }
 0x186   :  { %2307 = vmatpush1.bf16.msra.mxu1 %v3816_v50 }
 0x187   :  { %2266 = vmatpush1.bf16.msra.mxu0 %v3688_v53  ;;  %v853_v53 = vld [vmem:[#allocation7 + $0x580] sm:$0xff] }
 0x188   :  { %2267 = vmatprep.subr.bf16.mxu0 %v3697_v54  ;;  %v857_v54 = vld [vmem:[#allocation7 + $0x5a0] sm:$0xff] }
 0x18b   :  { %2268 = vmatpush1.bf16.msra.mxu0 %v3696_v57  ;;  %v3825_v57 = vcombine.high %v853_v53, %v857_v54 }
 0x18c   :  { %2269 = vmatprep.subr.bf16.mxu0 %v3705_v58  ;;  %v3824_v58 = vcombine.low %v853_v53, %v857_v54 }
 0x18d   :  { %2308 = vmatprep.subr.bf16.mxu1 %v3825_v57 }
 0x18e   :  { %2309 = vmatpush1.bf16.msra.mxu1 %v3824_v58  ;;  %v686_v58 = vld [vmem:[#allocation7 + $0x48] sm:$0xff] }
 0x18f   :  { %2270 = vmatpush1.bf16.msra.mxu0 %v3704_v61  ;;  %v861_v61 = vld [vmem:[#allocation7 + $0x5c0] sm:$0xff] }
 0x190   :  { %2271 = vmatprep.subr.bf16.mxu0 %v3713_v62  ;;  %v865_v62 = vld [vmem:[#allocation7 + $0x5e0] sm:$0xff] }
 0x191   :  { %v3833_v63 = vcombine.high %v861_v61, %v865_v62  ;;  %v3832_v0 = vcombine.low %v861_v61, %v865_v62 }
 0x193   :  { %2272 = vmatpush1.bf16.msra.mxu0 %v3712_v7  ;;  %2310 = vmatprep.subr.bf16.mxu1 %v3833_v63  ;;  %v3841_v7 = vcombine.high %v869_v3, %v873_v6  ;;  %v694_v63 = vld [vmem:[#allocation7 + $0x88] sm:$0xff] }
 0x194   :  { %2273 = vmatprep.subr.bf16.mxu0 %v3721_v9  ;;  %2311 = vmatpush1.bf16.msra.mxu1 %v3832_v0  ;;  %v3840_v9 = vcombine.low %v869_v3, %v873_v6  ;;  %v698_v0 = vld [vmem:[#allocation7 + $0xa8] sm:$0xff] }
 0x195   :  { %2312 = vmatprep.subr.bf16.mxu1 %v3841_v7  ;;  %v702_v3 = vld [vmem:[#allocation7 + $0xc8] sm:$0xff]  ;;  %v3666_v7 = vcombine.low %v694_v63, %v698_v0 }
 0x196   :  { %v706_v6 = vld [vmem:[#allocation7 + $0xe8] sm:$0xff] }
 0x197   :  { %2274 = vmatpush1.bf16.msra.mxu0 %v3720_v16  ;;  %v3857_v16 = vcombine.high %v885_v14, %v889_v15 }
 0x198   :  { %2275 = vmatprep.subr.bf16.mxu0 %v3729_v17  ;;  %2313 = vmatpush1.bf16.msra.mxu1 %v3840_v9  ;;  %v3856_v17 = vcombine.low %v885_v14, %v889_v15  ;;  %v3675_v9 = vcombine.high %v702_v3, %v706_v6  ;;  %v718_v14 = vld [vmem:[#allocation7 + $0x148] sm:$0xff] }
 0x199   :  { %2314 = vmatprep.subr.bf16.mxu1 %v3849_v12  ;;  %v3674_v12 = vcombine.low %v702_v3, %v706_v6  ;;  %v726_v15 = vld [vmem:[#allocation7 + $0x188] sm:$0xff] }
 0x19b   :  { %2276 = vmatpush1.bf16.msra.mxu0 %v3728_v24  ;;  %v3873_v24 = vcombine.high %v901_v22, %v905_v23 }
 0x19c   :  { %2277 = vmatprep.subr.bf16.mxu0 %v3737_v25  ;;  %2315 = vmatpush1.bf16.msra.mxu1 %v3848_v13  ;;  %v3872_v25 = vcombine.low %v901_v22, %v905_v23  ;;  %v3683_v13 = vcombine.high %v710_v10, %v714_v11  ;;  %v742_v23 = vld [vmem:[#allocation7 + $0x208] sm:$0xff] }
 0x19d   :  { %2316 = vmatprep.subr.bf16.mxu1 %v3857_v16  ;;  %v730_v16 = vld [vmem:[#allocation7 + $0x1a8] sm:$0xff] }
 0x19e   :  { %v3699_v18 = vcombine.high %v726_v15, %v730_v16 }
 0x19f   :  { %2278 = vmatpush1.bf16.msra.mxu0 %v3736_v32  ;;  %v3889_v32 = vcombine.high %v917_v30, %v921_v31 }
 0x1a0   :  { %2279 = vmatprep.subr.bf16.mxu0 %v3745_v33  ;;  %2317 = vmatpush1.bf16.msra.mxu1 %v3856_v17  ;;  %v3888_v33 = vcombine.low %v917_v30, %v921_v31  ;;  %v3690_v17 = vcombine.low %v718_v14, %v722_v4  ;;  %v758_v31 = vld [vmem:[#allocation7 + $0x288] sm:$0xff] }
 0x1a1   :  { %2318 = vmatprep.subr.bf16.mxu1 %v3865_v20  ;;  %v738_v20 = vld [vmem:[#allocation7 + $0x1e8] sm:$0xff] }
 0x1a2   :  { %v3707_v22 = vcombine.high %v734_v19, %v738_v20 }
 0x1a3   :  { %2280 = vmatpush1.bf16.msra.mxu0 %v3744_v42  ;;  %v3653_v42 = vcombine.high %v4642_v38, %v4644_v39 }
 0x1a4   :  { %2281 = vmatprep.subr.bf16.mxu0 %v3753_v44  ;;  %2319 = vmatpush1.bf16.msra.mxu1 %v3864_v21  ;;  %v3652_v44 = vcombine.low %v4642_v38, %v4644_v39  ;;  %v3698_v21 = vcombine.low %v726_v15, %v730_v16 }
 0x1a5   :  { %2320 = vmatprep.subr.bf16.mxu1 %v3873_v24  ;;  %v746_v24 = vld [vmem:[#allocation7 + $0x228] sm:$0xff] }
 0x1a6   :  { %v3715_v26 = vcombine.high %v742_v23, %v746_v24 }
 0x1a7   :  { %2282 = vmatpush1.bf16.msra.mxu0 %v3752_v51 }
 0x1a8   :  { %2283 = vmatprep.subr.bf16.mxu0 %v3761_v52  ;;  %2321 = vmatpush1.bf16.msra.mxu1 %v3872_v25  ;;  %v3706_v25 = vcombine.low %v734_v19, %v738_v20  ;;  %v814_v19 = vld [vmem:[#allocation7 + $0x448] sm:$0xff] }
 0x1a9   :  { %2322 = vmatprep.subr.bf16.mxu1 %v3881_v28  ;;  %v754_v28 = vld [vmem:[#allocation7 + $0x268] sm:$0xff] }
 0x1aa   :  { %v3723_v30 = vcombine.high %v750_v27, %v754_v28  ;;  %v818_v20 = vld [vmem:[#allocation7 + $0x468] sm:$0xff] }
 0x1ab   :  { %2284 = vmatpush1.bf16.msra.mxu0 %v3760_v59  ;;  %v690_v59 = vld [vmem:[#allocation7 + $0x68] sm:$0xff] }
 0x1ac   :  { %2285 = vmatprep.subr.bf16.mxu0 %v3769_v60  ;;  %2323 = vmatpush1.bf16.msra.mxu1 %v3880_v29  ;;  %v3659_v62 = vcombine.high %v686_v58, %v690_v59  ;;  %v3714_v29 = vcombine.low %v742_v23, %v746_v24  ;;  %v695_v24 = vld [vmem:[#allocation7 + $0x90] sm:$0xff] }
 0x1ad   :  { %2324 = vmatprep.subr.bf16.mxu1 %v3889_v32  ;;  %v762_v32 = vld [vmem:[#allocation7 + $0x2a8] sm:$0xff] }
 0x1ae   :  { %v3731_v34 = vcombine.high %v758_v31, %v762_v32 }
 0x1af   :  { %2286 = vmatpush1.bf16.msra.mxu0 %v3768_v1  ;;  %v3658_v1 = vcombine.low %v686_v58, %v690_v59 }
 0x1b0   :  { %2337 = vmatprep.subr.bf16.mxu0 %v3651_v2  ;;  %2325 = vmatpush1.bf16.msra.mxu1 %v3888_v33  ;;  %v3667_v2 = vcombine.high %v694_v63, %v698_v0  ;;  %v3722_v33 = vcombine.low %v750_v27, %v754_v28  ;;  %v798_v0 = vld [vmem:[#allocation7 + $0x3c8] sm:$0xff]  ;;  %v699_v27 = vld [vmem:[#allocation7 + $0xb0] sm:$0xff] }
 0x1b1   :  { %2326 = vmatprep.subr.bf16.mxu1 %v3897_v36  ;;  %v770_v36 = vld [vmem:[#allocation7 + $0x2e8] sm:$0xff] }
 0x1b2   :  { %v822_v28 = vld [vmem:[#allocation7 + $0x488] sm:$0xff] }
 0x1b4   :  { %2327 = vmatpush1.bf16.msra.mxu1 %v3896_v37  ;;  %v3730_v37 = vcombine.low %v758_v31, %v762_v32  ;;  %v3786_v31 = vcombine.low %v814_v19, %v818_v20  ;;  %v3669_v32 = vcombine.high %v695_v24, %v699_v27 }
 0x1b5   :  { %2419 = vmatprep.subr.bf16.mxu1 %v3653_v42  ;;  %v3739_v42 = vcombine.high %v766_v35, %v770_v36 }
 0x205   :  { %v617_v48 = vpop.f32.mrb[4].mxu0 }
 0x206   :  { %v618_v49 = vadd.f32 %v617_v48, %v246_v46  ;;  %v619_v50 = vpop.f32.mrb[5].mxu0  ;;  %v774_v46 = vld [vmem:[#allocation7 + $0x308] sm:$0xff]  ;;  %v3738_v48 = vcombine.low %v766_v35, %v770_v36  ;;  %v707_v35 = vld [vmem:[#allocation7 + $0xf0] sm:$0xff] }
 0x207   :  { %v620_v51 = vadd.f32 %v619_v50, %v250_v47  ;;  %v621_v52 = vpop.f32.mrb[6].mxu0  ;;  %v778_v47 = vld [vmem:[#allocation7 + $0x328] sm:$0xff] }
 0x208   :  { %v665_v53 = vmul.f32 0.2, %v618_v49  ;;  %v622_v54 = vpop.f32.mrb[7].mxu0  ;;  %v782_v50 = vld [vmem:[#allocation7 + $0x348] sm:$0xff]  ;;  %v3746_v52 = vcombine.low %v774_v46, %v778_v47 }
 0x209   :  { %v666_v55 = vmul.f32 0.2, %v620_v51  ;;  %v253_v54 = vsub.s32 2, %v4617_v40  ;;  %v830_v36 = vld [vmem:[#allocation7 + $0x4c8] sm:$0xff] }
 0x20a   :  { %v669_v56 = vmax.f32 %v618_v49, %v665_v53  ;;  %v3747_v49 = vcombine.high %v774_v46, %v778_v47  ;;  %v711_v46 = vld [vmem:[#allocation7 + $0x110] sm:$0xff] }
 0x20b   :  { %v670_v57 = vmax.f32 %v620_v51, %v666_v55  ;;  %v786_v51 = vld [vmem:[#allocation7 + $0x368] sm:$0xff]  ;;  %v257_v55 = vsub.s32 3, %v4617_v40  ;;  %v254_v59 = vrot.slane %v4653_v45, %v253_v54  ;;  %v715_v47 = vld [vmem:[#allocation7 + $0x130] sm:$0xff] }
 0x20c   :  { %v4661_v61 = vpack.c.bf16 %v669_v56, %v669_v56  ;;  %v3755_v53 = vcombine.high %v782_v50, %v786_v51  ;;  %v790_v56 = vld [vmem:[#allocation7 + $0x388] sm:$0xff]  ;;  %v3754_v58 = vcombine.low %v782_v50, %v786_v51 }
 0x20d   :  { %v4659_v60 = vpack.c.bf16 %v670_v57, %v670_v57  ;;  %v794_v57 = vld [vmem:[#allocation7 + $0x3a8] sm:$0xff]  ;;  %v258_v63 = vrot.slane %v4653_v45, %v257_v55 }
 0x20e   :  { %v3762_v3 = vcombine.low %v790_v56, %v794_v57 }
 0x20f   :  { %2287 = vmatprep.mubr.bf16.mxu0 %v4659_v60 }
 0x210   :  { %2288 = vmatmul.mubr.bf16.vlgmr.msra.gmra.mrb[12].mxu0 %v4661_v61 }
 0x211   :  { %2338 = vmatpush1.bf16.msra.mxu0 %v3650_v8  ;;  %2369 = vmatprep.mubr.bf16.mxu0 %v4659_v60  ;;  %v3691_v8 = vcombine.high %v718_v14, %v722_v4 }
 0x212   :  { %2339 = vmatprep.subr.bf16.mxu0 %v3659_v62  ;;  %v3763_v62 = vcombine.high %v790_v56, %v794_v57  ;;  %v719_v56 = vld [vmem:[#allocation7 + $0x150] sm:$0xff] }
 0x213   :  { %v723_v57 = vld [vmem:[#allocation7 + $0x170] sm:$0xff] }
 0x215   :  { %2340 = vmatpush1.bf16.msra.mxu0 %v3658_v1  ;;  %v802_v1 = vld [vmem:[#allocation7 + $0x3e8] sm:$0xff] }
 0x216   :  { %2341 = vmatprep.subr.bf16.mxu0 %v3667_v2 }
 0x219   :  { %2342 = vmatpush1.bf16.msra.mxu0 %v3666_v7 }
 0x21a   :  { %2343 = vmatprep.subr.bf16.mxu0 %v3675_v9  ;;  %v3771_v9 = vcombine.high %v798_v0, %v802_v1 }
 0x21d   :  { %2344 = vmatpush1.bf16.msra.mxu0 %v3674_v12  ;;  %v806_v12 = vld [vmem:[#allocation7 + $0x408] sm:$0xff] }
 0x21e   :  { %2345 = vmatprep.subr.bf16.mxu0 %v3683_v13  ;;  %v810_v13 = vld [vmem:[#allocation7 + $0x428] sm:$0xff] }
 0x21f   :  { %v3779_v45 = vcombine.high %v806_v12, %v810_v13 }
 0x221   :  { %2346 = vmatpush1.bf16.msra.mxu0 %v3682_v5 }
 0x222   :  { %2347 = vmatprep.subr.bf16.mxu0 %v3691_v8  ;;  %v3770_v8 = vcombine.low %v798_v0, %v802_v1  ;;  %v3693_v0 = vcombine.high %v719_v56, %v723_v57 }
 0x225   :  { %2348 = vmatpush1.bf16.msra.mxu0 %v3690_v17  ;;  %v687_v17 = vld [vmem:[#allocation7 + $0x50] sm:$0xff] }
 0x226   :  { %2349 = vmatprep.subr.bf16.mxu0 %v3699_v18  ;;  %v691_v18 = vld [vmem:[#allocation7 + $0x70] sm:$0xff] }
 0x229   :  { %2350 = vmatpush1.bf16.msra.mxu0 %v3698_v21 }
 0x22a   :  { %2351 = vmatprep.subr.bf16.mxu0 %v3707_v22  ;;  %v3778_v22 = vcombine.low %v806_v12, %v810_v13  ;;  %v735_v13 = vld [vmem:[#allocation7 + $0x1d0] sm:$0xff] }
 0x22d   :  { %2352 = vmatpush1.bf16.msra.mxu0 %v3706_v25  ;;  %v3661_v25 = vcombine.high %v687_v17, %v691_v18 }
 0x22e   :  { %2353 = vmatprep.subr.bf16.mxu0 %v3715_v26  ;;  %v3787_v26 = vcombine.high %v814_v19, %v818_v20  ;;  %v870_v19 = vld [vmem:[#allocation7 + $0x608] sm:$0xff] }
 0x22f   :  { %v874_v20 = vld [vmem:[#allocation7 + $0x628] sm:$0xff] }
 0x231   :  { %2354 = vmatpush1.bf16.msra.mxu0 %v3714_v29  ;;  %v826_v29 = vld [vmem:[#allocation7 + $0x4a8] sm:$0xff] }
 0x232   :  { %2355 = vmatprep.subr.bf16.mxu0 %v3723_v30  ;;  %v3660_v30 = vcombine.low %v687_v17, %v691_v18  ;;  %v3794_v38 = vcombine.low %v822_v28, %v826_v29  ;;  %v743_v17 = vld [vmem:[#allocation7 + $0x210] sm:$0xff] }
 0x233   :  { %v747_v18 = vld [vmem:[#allocation7 + $0x230] sm:$0xff] }
 0x235   :  { %2356 = vmatpush1.bf16.msra.mxu0 %v3722_v33  ;;  %v3795_v33 = vcombine.high %v822_v28, %v826_v29  ;;  %v755_v28 = vld [vmem:[#allocation7 + $0x270] sm:$0xff]  ;;  %v878_v29 = vld [vmem:[#allocation7 + $0x648] sm:$0xff] }
 0x236   :  { %2357 = vmatprep.subr.bf16.mxu0 %v3731_v34  ;;  %v703_v34 = vld [vmem:[#allocation7 + $0xd0] sm:$0xff] }
 0x237   :  { %v3677_v39 = vcombine.high %v703_v34, %v707_v35  ;;  %v3676_v50 = vcombine.low %v703_v34, %v707_v35  ;;  %v759_v35 = vld [vmem:[#allocation7 + $0x290] sm:$0xff] }
 0x239   :  { %2358 = vmatpush1.bf16.msra.mxu0 %v3730_v37  ;;  %v834_v37 = vld [vmem:[#allocation7 + $0x4e8] sm:$0xff] }
 0x23a   :  { %2359 = vmatprep.subr.bf16.mxu0 %v3739_v42  ;;  %v3668_v42 = vcombine.low %v695_v24, %v699_v27  ;;  %v3802_v51 = vcombine.low %v830_v36, %v834_v37  ;;  %v751_v27 = vld [vmem:[#allocation7 + $0x250] sm:$0xff] }
 0x23d   :  { %2360 = vmatpush1.bf16.msra.mxu0 %v3738_v48  ;;  %v838_v48 = vld [vmem:[#allocation7 + $0x508] sm:$0xff] }
 0x23e   :  { %2361 = vmatprep.subr.bf16.mxu0 %v3747_v49  ;;  %v842_v49 = vld [vmem:[#allocation7 + $0x528] sm:$0xff] }
 0x241   :  { %2362 = vmatpush1.bf16.msra.mxu0 %v3746_v52  ;;  %v3685_v52 = vcombine.high %v711_v46, %v715_v47 }
 0x242   :  { %2363 = vmatprep.subr.bf16.mxu0 %v3755_v53  ;;  %v3811_v53 = vcombine.high %v838_v48, %v842_v49 }
 0x245   :  { %v658_v2 = vpop.f32.mrb[8].mxu0  ;;  %2364 = vmatpush1.bf16.msra.mxu0 %v3754_v58  ;;  %v846_v58 = vld [vmem:[#allocation7 + $0x548] sm:$0xff] }
 0x246   :  { %v659_v6 = vadd.f32 %v658_v2, %v254_v59  ;;  %v660_v7 = vpop.f32.mrb[9].mxu0  ;;  %2365 = vmatprep.subr.bf16.mxu0 %v3763_v62  ;;  %v850_v59 = vld [vmem:[#allocation7 + $0x568] sm:$0xff]  ;;  %v3684_v62 = vcombine.low %v711_v46, %v715_v47  ;;  %v727_v2 = vld [vmem:[#allocation7 + $0x190] sm:$0xff] }
 0x247   :  { %v661_v10 = vadd.f32 %v660_v7, %v258_v63  ;;  %v662_v11 = vpop.f32.mrb[10].mxu0  ;;  %v3810_v63 = vcombine.low %v838_v48, %v842_v49  ;;  %v3819_v1 = vcombine.high %v846_v58, %v850_v59  ;;  %v858_v7 = vld [vmem:[#allocation7 + $0x5a8] sm:$0xff]  ;;  %v767_v47 = vld [vmem:[#allocation7 + $0x2d0] sm:$0xff] }
 0x248   :  { %v667_v14 = vmul.f32 0.2, %v659_v6  ;;  %v663_v4 = vpop.f32.mrb[11].mxu0  ;;  %v771_v48 = vld [vmem:[#allocation7 + $0x2f0] sm:$0xff]  ;;  %v894_v49 = vld [vmem:[#allocation7 + $0x6c8] sm:$0xff] }
 0x249   :  { %v668_v5 = vmul.f32 0.2, %v661_v10  ;;  %2366 = vmatpush1.bf16.msra.mxu0 %v3762_v3  ;;  %v731_v3 = vld [vmem:[#allocation7 + $0x1b0] sm:$0xff]  ;;  %v862_v4 = vld [vmem:[#allocation7 + $0x5c8] sm:$0xff] }
 0x24a   :  { %v671_v15 = vmax.f32 %v659_v6, %v667_v14  ;;  %2367 = vmatprep.subr.bf16.mxu0 %v3771_v9  ;;  %v854_v6 = vld [vmem:[#allocation7 + $0x588] sm:$0xff]  ;;  %v3692_v9 = vcombine.low %v719_v56, %v723_v57  ;;  %v3701_v11 = vcombine.high %v727_v2, %v731_v3  ;;  %v739_v14 = vld [vmem:[#allocation7 + $0x1f0] sm:$0xff] }
 0x24b   :  { %v672_v16 = vmax.f32 %v661_v10, %v668_v5  ;;  %v3818_v10 = vcombine.low %v846_v58, %v850_v59  ;;  %v3827_v12 = vcombine.high %v854_v6, %v858_v7  ;;  %v866_v5 = vld [vmem:[#allocation7 + $0x5e8] sm:$0xff]  ;;  %v775_v57 = vld [vmem:[#allocation7 + $0x310] sm:$0xff] }
 0x24c   :  { %v4679_v23 = vpack.c.bf16 %v671_v15, %v671_v15  ;;  %v3826_v15 = vcombine.low %v854_v6, %v858_v7  ;;  %v3834_v24 = vcombine.low %v862_v4, %v866_v5  ;;  %v779_v58 = vld [vmem:[#allocation7 + $0x330] sm:$0xff]  ;;  %v902_v59 = vld [vmem:[#allocation7 + $0x708] sm:$0xff] }
 0x24d   :  { %v4677_v21 = vpack.c.bf16 %v672_v16, %v672_v16  ;;  %2368 = vmatpush1.bf16.msra.mxu0 %v3770_v8  ;;  %v3700_v8 = vcombine.low %v727_v2, %v731_v3  ;;  %v3835_v16 = vcombine.high %v862_v4, %v866_v5  ;;  %v783_v3 = vld [vmem:[#allocation7 + $0x350] sm:$0xff]  ;;  %v910_v7 = vld [vmem:[#allocation7 + $0x748] sm:$0xff] }
 0x24e   :  { %2378 = vmatprep.subr.bf16.mxu0 %v3779_v45  ;;  %v3709_v45 = vcombine.high %v735_v13, %v739_v14  ;;  %v787_v6 = vld [vmem:[#allocation7 + $0x370] sm:$0xff]  ;;  %v918_v5 = vld [vmem:[#allocation7 + $0x788] sm:$0xff] }
 0x24f   :  { %2328 = vmatprep.mubr.bf16.mxu1 %v4677_v21  ;;  %v795_v4 = vld [vmem:[#allocation7 + $0x3b0] sm:$0xff] }
 0x250   :  { %2329 = vmatmul.mubr.bf16.vlgmr.msra.gmra.mrb[0].mxu1 %v4679_v23  ;;  %2370 = vmatmul.mubr.bf16.vlgmr.msra.gmra.mrb[16].mxu0 %v4661_v61 }
 0x251   :  { %2420 = vmatpush1.bf16.msra.mxu1 %v3652_v44  ;;  %2379 = vmatpush1.bf16.msra.mxu0 %v3778_v22  ;;  %v3803_v44 = vcombine.high %v830_v36, %v834_v37  ;;  %v3708_v22 = vcombine.low %v735_v13, %v739_v14  ;;  %v763_v36 = vld [vmem:[#allocation7 + $0x2b0] sm:$0xff]  ;;  %v886_v37 = vld [vmem:[#allocation7 + $0x688] sm:$0xff] }
 0x252   :  { %2410 = vmatprep.mubr.bf16.mxu0 %v4677_v21  ;;  %2451 = vmatprep.mubr.bf16.mxu1 %v4659_v60  ;;  %v791_v14 = vld [vmem:[#allocation7 + $0x390] sm:$0xff] }
 0x253   :  { %2421 = vmatprep.subr.bf16.mxu1 %v3661_v25  ;;  %2380 = vmatprep.subr.bf16.mxu0 %v3787_v26  ;;  %v3717_v25 = vcombine.high %v743_v17, %v747_v18  ;;  %v3843_v26 = vcombine.high %v870_v19, %v874_v20 }
 0x255   :  { %2422 = vmatpush1.bf16.msra.mxu1 %v3660_v30  ;;  %2381 = vmatpush1.bf16.msra.mxu0 %v3786_v31  ;;  %v882_v30 = vld [vmem:[#allocation7 + $0x668] sm:$0xff]  ;;  %v3716_v31 = vcombine.low %v743_v17, %v747_v18  ;;  %v799_v18 = vld [vmem:[#allocation7 + $0x3d0] sm:$0xff] }
 0x256   :  { %2423 = vmatprep.subr.bf16.mxu1 %v3669_v32  ;;  %2382 = vmatprep.subr.bf16.mxu0 %v3795_v33  ;;  %v3842_v32 = vcombine.low %v870_v19, %v874_v20  ;;  %v3725_v33 = vcombine.high %v751_v27, %v755_v28  ;;  %v3851_v34 = vcombine.high %v878_v29, %v882_v30  ;;  %v803_v19 = vld [vmem:[#allocation7 + $0x3f0] sm:$0xff]  ;;  %v926_v20 = vld [vmem:[#allocation7 + $0x7c8] sm:$0xff] }
 0x259   :  { %2424 = vmatpush1.bf16.msra.mxu1 %v3668_v42  ;;  %2383 = vmatpush1.bf16.msra.mxu0 %v3794_v38  ;;  %v890_v42 = vld [vmem:[#allocation7 + $0x6a8] sm:$0xff]  ;;  %v3724_v38 = vcombine.low %v751_v27, %v755_v28  ;;  %v807_v28 = vld [vmem:[#allocation7 + $0x410] sm:$0xff] }
 0x25a   :  { %2425 = vmatprep.subr.bf16.mxu1 %v3677_v39  ;;  %2384 = vmatprep.subr.bf16.mxu0 %v3803_v44  ;;  %v3850_v39 = vcombine.low %v878_v29, %v882_v30  ;;  %v3733_v44 = vcombine.high %v759_v35, %v763_v36  ;;  %v3859_v46 = vcombine.high %v886_v37, %v890_v42  ;;  %v811_v29 = vld [vmem:[#allocation7 + $0x430] sm:$0xff]  ;;  %v680_v30 = vld [vmem:[#allocation7 + $0x18] sm:$0xff] }
 0x25d   :  { %2426 = vmatpush1.bf16.msra.mxu1 %v3676_v50  ;;  %2385 = vmatpush1.bf16.msra.mxu0 %v3802_v51  ;;  %v898_v50 = vld [vmem:[#allocation7 + $0x6e8] sm:$0xff]  ;;  %v3732_v51 = vcombine.low %v759_v35, %v763_v36  ;;  %v815_v36 = vld [vmem:[#allocation7 + $0x450] sm:$0xff] }
 0x25e   :  { %2427 = vmatprep.subr.bf16.mxu1 %v3685_v52  ;;  %2386 = vmatprep.subr.bf16.mxu0 %v3811_v53  ;;  %v3858_v52 = vcombine.low %v886_v37, %v890_v42  ;;  %v3741_v53 = vcombine.high %v767_v47, %v771_v48  ;;  %v3867_v56 = vcombine.high %v894_v49, %v898_v50  ;;  %v819_v37 = vld [vmem:[#allocation7 + $0x470] sm:$0xff]  ;;  %v688_v42 = vld [vmem:[#allocation7 + $0x58] sm:$0xff] }
 0x261   :  { %2428 = vmatpush1.bf16.msra.mxu1 %v3684_v62  ;;  %2387 = vmatpush1.bf16.msra.mxu0 %v3810_v63  ;;  %v906_v62 = vld [vmem:[#allocation7 + $0x728] sm:$0xff]  ;;  %v3740_v63 = vcombine.low %v767_v47, %v771_v48  ;;  %v823_v48 = vld [vmem:[#allocation7 + $0x490] sm:$0xff] }
 0x262   :  { %2429 = vmatprep.subr.bf16.mxu1 %v3693_v0  ;;  %2388 = vmatprep.subr.bf16.mxu0 %v3819_v1  ;;  %v3866_v0 = vcombine.low %v894_v49, %v898_v50  ;;  %v3749_v1 = vcombine.high %v775_v57, %v779_v58  ;;  %v3875_v2 = vcombine.high %v902_v59, %v906_v62  ;;  %v827_v49 = vld [vmem:[#allocation7 + $0x4b0] sm:$0xff]  ;;  %v696_v50 = vld [vmem:[#allocation7 + $0x98] sm:$0xff] }
 0x265   :  { %2430 = vmatpush1.bf16.msra.mxu1 %v3692_v9  ;;  %2389 = vmatpush1.bf16.msra.mxu0 %v3818_v10  ;;  %v914_v9 = vld [vmem:[#allocation7 + $0x768] sm:$0xff]  ;;  %v3748_v10 = vcombine.low %v775_v57, %v779_v58  ;;  %v831_v58 = vld [vmem:[#allocation7 + $0x4d0] sm:$0xff] }
 0x266   :  { %2431 = vmatprep.subr.bf16.mxu1 %v3701_v11  ;;  %2390 = vmatprep.subr.bf16.mxu0 %v3827_v12  ;;  %v3874_v11 = vcombine.low %v902_v59, %v906_v62  ;;  %v3757_v12 = vcombine.high %v783_v3, %v787_v6  ;;  %v3883_v13 = vcombine.high %v910_v7, %v914_v9  ;;  %v835_v59 = vld [vmem:[#allocation7 + $0x4f0] sm:$0xff]  ;;  %v704_v62 = vld [vmem:[#allocation7 + $0xd8] sm:$0xff] }
 0x269   :  { %2432 = vmatpush1.bf16.msra.mxu1 %v3700_v8  ;;  %2391 = vmatpush1.bf16.msra.mxu0 %v3826_v15  ;;  %v922_v8 = vld [vmem:[#allocation7 + $0x7a8] sm:$0xff]  ;;  %v3756_v15 = vcombine.low %v783_v3, %v787_v6  ;;  %v839_v6 = vld [vmem:[#allocation7 + $0x510] sm:$0xff] }
 0x26a   :  { %2433 = vmatprep.subr.bf16.mxu1 %v3709_v45  ;;  %2392 = vmatprep.subr.bf16.mxu0 %v3835_v16  ;;  %v3882_v45 = vcombine.low %v910_v7, %v914_v9  ;;  %v3765_v16 = vcombine.high %v791_v14, %v795_v4  ;;  %v3891_v17 = vcombine.high %v918_v5, %v922_v8  ;;  %v843_v7 = vld [vmem:[#allocation7 + $0x530] sm:$0xff]  ;;  %v716_v9 = vld [vmem:[#allocation7 + $0x138] sm:$0xff] }
 0x26d   :  { %2434 = vmatpush1.bf16.msra.mxu1 %v3708_v22  ;;  %2393 = vmatpush1.bf16.msra.mxu0 %v3834_v24  ;;  %v930_v22 = vld [vmem:[#allocation7 + $0x7e8] sm:$0xff]  ;;  %v3764_v24 = vcombine.low %v791_v14, %v795_v4  ;;  %v847_v14 = vld [vmem:[#allocation7 + $0x550] sm:$0xff] }
 0x26e   :  { %2435 = vmatprep.subr.bf16.mxu1 %v3717_v25  ;;  %2394 = vmatprep.subr.bf16.mxu0 %v3843_v26  ;;  %v3890_v25 = vcombine.low %v918_v5, %v922_v8  ;;  %v3773_v26 = vcombine.high %v799_v18, %v803_v19  ;;  %v3899_v27 = vcombine.high %v926_v20, %v930_v22  ;;  %v851_v4 = vld [vmem:[#allocation7 + $0x570] sm:$0xff]  ;;  %v720_v5 = vld [vmem:[#allocation7 + $0x158] sm:$0xff] }
 0x26f   :  { %v724_v8 = vld [vmem:[#allocation7 + $0x178] sm:$0xff] }
 0x271   :  { %2436 = vmatpush1.bf16.msra.mxu1 %v3716_v31  ;;  %2395 = vmatpush1.bf16.msra.mxu0 %v3842_v32  ;;  %v684_v31 = vld [vmem:[#allocation7 + $0x38] sm:$0xff]  ;;  %v3772_v32 = vcombine.low %v799_v18, %v803_v19  ;;  %v855_v18 = vld [vmem:[#allocation7 + $0x590] sm:$0xff] }
 0x272   :  { %2437 = vmatprep.subr.bf16.mxu1 %v3725_v33  ;;  %2396 = vmatprep.subr.bf16.mxu0 %v3851_v34  ;;  %v3898_v33 = vcombine.low %v926_v20, %v930_v22  ;;  %v3781_v34 = vcombine.high %v807_v28, %v811_v29  ;;  %v3655_v35 = vcombine.high %v680_v30, %v684_v31  ;;  %v859_v19 = vld [vmem:[#allocation7 + $0x5b0] sm:$0xff]  ;;  %v728_v20 = vld [vmem:[#allocation7 + $0x198] sm:$0xff] }
 0x273   :  { %v732_v22 = vld [vmem:[#allocation7 + $0x1b8] sm:$0xff] }
 0x275   :  { %2438 = vmatpush1.bf16.msra.mxu1 %v3724_v38  ;;  %2397 = vmatpush1.bf16.msra.mxu0 %v3850_v39  ;;  %v692_v38 = vld [vmem:[#allocation7 + $0x78] sm:$0xff]  ;;  %v3780_v39 = vcombine.low %v807_v28, %v811_v29  ;;  %v863_v28 = vld [vmem:[#allocation7 + $0x5d0] sm:$0xff] }
 0x276   :  { %2439 = vmatprep.subr.bf16.mxu1 %v3733_v44  ;;  %2398 = vmatprep.subr.bf16.mxu0 %v3859_v46  ;;  %v3654_v44 = vcombine.low %v680_v30, %v684_v31  ;;  %v3789_v46 = vcombine.high %v815_v36, %v819_v37  ;;  %v3663_v47 = vcombine.high %v688_v42, %v692_v38  ;;  %v867_v29 = vld [vmem:[#allocation7 + $0x5f0] sm:$0xff]  ;;  %v736_v30 = vld [vmem:[#allocation7 + $0x1d8] sm:$0xff] }
 0x277   :  { %v740_v31 = vld [vmem:[#allocation7 + $0x1f8] sm:$0xff] }
 0x279   :  { %2440 = vmatpush1.bf16.msra.mxu1 %v3732_v51  ;;  %2399 = vmatpush1.bf16.msra.mxu0 %v3858_v52  ;;  %v700_v51 = vld [vmem:[#allocation7 + $0xb8] sm:$0xff]  ;;  %v3788_v52 = vcombine.low %v815_v36, %v819_v37  ;;  %v871_v36 = vld [vmem:[#allocation7 + $0x610] sm:$0xff] }
 0x27a   :  { %2441 = vmatprep.subr.bf16.mxu1 %v3741_v53  ;;  %2400 = vmatprep.subr.bf16.mxu0 %v3867_v56  ;;  %v3662_v53 = vcombine.low %v688_v42, %v692_v38  ;;  %v3797_v56 = vcombine.high %v823_v48, %v827_v49  ;;  %v3671_v57 = vcombine.high %v696_v50, %v700_v51  ;;  %v875_v37 = vld [vmem:[#allocation7 + $0x630] sm:$0xff]  ;;  %v744_v42 = vld [vmem:[#allocation7 + $0x218] sm:$0xff] }
 0x27b   :  { %v748_v38 = vld [vmem:[#allocation7 + $0x238] sm:$0xff] }
 0x27d   :  { %2442 = vmatpush1.bf16.msra.mxu1 %v3740_v63  ;;  %2401 = vmatpush1.bf16.msra.mxu0 %v3866_v0  ;;  %v708_v63 = vld [vmem:[#allocation7 + $0xf8] sm:$0xff]  ;;  %v3796_v0 = vcombine.low %v823_v48, %v827_v49  ;;  %v879_v48 = vld [vmem:[#allocation7 + $0x650] sm:$0xff] }
 0x27e   :  { %2443 = vmatprep.subr.bf16.mxu1 %v3749_v1  ;;  %2402 = vmatprep.subr.bf16.mxu0 %v3875_v2  ;;  %v3670_v1 = vcombine.low %v696_v50, %v700_v51  ;;  %v3805_v2 = vcombine.high %v831_v58, %v835_v59  ;;  %v3679_v3 = vcombine.high %v704_v62, %v708_v63  ;;  %v883_v49 = vld [vmem:[#allocation7 + $0x670] sm:$0xff]  ;;  %v752_v50 = vld [vmem:[#allocation7 + $0x258] sm:$0xff] }
 0x27f   :  { %v756_v51 = vld [vmem:[#allocation7 + $0x278] sm:$0xff] }
 0x281   :  { %2444 = vmatpush1.bf16.msra.mxu1 %v3748_v10  ;;  %2403 = vmatpush1.bf16.msra.mxu0 %v3874_v11  ;;  %v3804_v10 = vcombine.low %v831_v58, %v835_v59  ;;  %v3678_v11 = vcombine.low %v704_v62, %v708_v63  ;;  %v887_v58 = vld [vmem:[#allocation7 + $0x690] sm:$0xff]  ;;  %v760_v62 = vld [vmem:[#allocation7 + $0x298] sm:$0xff] }
 0x282   :  { %2445 = vmatprep.subr.bf16.mxu1 %v3757_v12  ;;  %2404 = vmatprep.subr.bf16.mxu0 %v3883_v13  ;;  %v3813_v12 = vcombine.high %v839_v6, %v843_v7  ;;  %v891_v59 = vld [vmem:[#allocation7 + $0x6b0] sm:$0xff]  ;;  %v764_v63 = vld [vmem:[#allocation7 + $0x2b8] sm:$0xff] }
 0x285   :  { %2446 = vmatpush1.bf16.msra.mxu1 %v3756_v15  ;;  %2405 = vmatpush1.bf16.msra.mxu0 %v3882_v45  ;;  %v3812_v15 = vcombine.low %v839_v6, %v843_v7  ;;  %v895_v6 = vld [vmem:[#allocation7 + $0x6d0] sm:$0xff] }
 0x286   :  { %2447 = vmatprep.subr.bf16.mxu1 %v3765_v16  ;;  %2406 = vmatprep.subr.bf16.mxu0 %v3891_v17  ;;  %v3821_v16 = vcombine.high %v847_v14, %v851_v4  ;;  %v3695_v17 = vcombine.high %v720_v5, %v724_v8  ;;  %v899_v7 = vld [vmem:[#allocation7 + $0x6f0] sm:$0xff] }
 0x289   :  { %2448 = vmatpush1.bf16.msra.mxu1 %v3764_v24  ;;  %2407 = vmatpush1.bf16.msra.mxu0 %v3890_v25  ;;  %v3820_v24 = vcombine.low %v847_v14, %v851_v4  ;;  %v3694_v25 = vcombine.low %v720_v5, %v724_v8  ;;  %v903_v14 = vld [vmem:[#allocation7 + $0x710] sm:$0xff]  ;;  %v776_v5 = vld [vmem:[#allocation7 + $0x318] sm:$0xff] }
 0x28a   :  { %2449 = vmatprep.subr.bf16.mxu1 %v3773_v26  ;;  %2408 = vmatprep.subr.bf16.mxu0 %v3899_v27  ;;  %v3829_v26 = vcombine.high %v855_v18, %v859_v19  ;;  %v3703_v27 = vcombine.high %v728_v20, %v732_v22  ;;  %v907_v4 = vld [vmem:[#allocation7 + $0x730] sm:$0xff]  ;;  %v780_v8 = vld [vmem:[#allocation7 + $0x338] sm:$0xff] }
 0x28d   :  { %2450 = vmatpush1.bf16.msra.mxu1 %v3772_v32  ;;  %2409 = vmatpush1.bf16.msra.mxu0 %v3898_v33  ;;  %v3828_v32 = vcombine.low %v855_v18, %v859_v19  ;;  %v3702_v33 = vcombine.low %v728_v20, %v732_v22  ;;  %v911_v18 = vld [vmem:[#allocation7 + $0x750] sm:$0xff]  ;;  %v784_v20 = vld [vmem:[#allocation7 + $0x358] sm:$0xff] }
 0x28e   :  { %2460 = vmatprep.subr.bf16.mxu1 %v3781_v34  ;;  %2501 = vmatprep.subr.bf16.mxu0 %v3655_v35  ;;  %v3837_v34 = vcombine.high %v863_v28, %v867_v29  ;;  %v3711_v35 = vcombine.high %v736_v30, %v740_v31  ;;  %v915_v19 = vld [vmem:[#allocation7 + $0x770] sm:$0xff]  ;;  %v788_v22 = vld [vmem:[#allocation7 + $0x378] sm:$0xff] }
 0x290   :  { %2452 = vmatmul.mubr.bf16.vlgmr.msra.gmra.mrb[4].mxu1 %v4661_v61  ;;  %2411 = vmatmul.mubr.bf16.vlgmr.msra.gmra.mrb[16].mxu0 %v4679_v23 }
 0x291   :  { %2461 = vmatpush1.bf16.msra.mxu1 %v3780_v39  ;;  %2492 = vmatprep.mubr.bf16.mxu1 %v4677_v21  ;;  %v3836_v39 = vcombine.low %v863_v28, %v867_v29  ;;  %v919_v28 = vld [vmem:[#allocation7 + $0x790] sm:$0xff] }
 0x292   :  { %2502 = vmatpush1.bf16.msra.mxu0 %v3654_v44  ;;  %2533 = vmatprep.mubr.bf16.mxu0 %v4659_v60  ;;  %v712_v60 = vld [vmem:[#allocation7 + $0x118] sm:$0xff]  ;;  %v3710_v44 = vcombine.low %v736_v30, %v740_v31  ;;  %v923_v29 = vld [vmem:[#allocation7 + $0x7b0] sm:$0xff] }
 0x293   :  { %2462 = vmatprep.subr.bf16.mxu1 %v3789_v46  ;;  %2503 = vmatprep.subr.bf16.mxu0 %v3663_v47  ;;  %v3687_v13 = vcombine.high %v712_v60, %v716_v9  ;;  %v3686_v45 = vcombine.low %v712_v60, %v716_v9  ;;  %v3845_v46 = vcombine.high %v871_v36, %v875_v37  ;;  %v768_v60 = vld [vmem:[#allocation7 + $0x2d8] sm:$0xff] }
 0x294   :  { %v3719_v47 = vcombine.high %v744_v42, %v748_v38  ;;  %v772_v9 = vld [vmem:[#allocation7 + $0x2f8] sm:$0xff] }
 0x295   :  { %2463 = vmatpush1.bf16.msra.mxu1 %v3788_v52  ;;  %v3844_v52 = vcombine.low %v871_v36, %v875_v37  ;;  %v792_v30 = vld [vmem:[#allocation7 + $0x398] sm:$0xff]  ;;  %v927_v36 = vld [vmem:[#allocation7 + $0x7d0] sm:$0xff] }
 0x296   :  { %2504 = vmatpush1.bf16.msra.mxu0 %v3662_v53  ;;  %2464 = vmatprep.subr.bf16.mxu1 %v3797_v56  ;;  %v3718_v53 = vcombine.low %v744_v42, %v748_v38  ;;  %v3853_v56 = vcombine.high %v879_v48, %v883_v49  ;;  %v796_v31 = vld [vmem:[#allocation7 + $0x3b8] sm:$0xff]  ;;  %v931_v37 = vld [vmem:[#allocation7 + $0x7f0] sm:$0xff] }
 0x297   :  { %2505 = vmatprep.subr.bf16.mxu0 %v3671_v57  ;;  %v3727_v57 = vcombine.high %v752_v50, %v756_v51  ;;  %v800_v42 = vld [vmem:[#allocation7 + $0x3d8] sm:$0xff] }
 0x298   :  { %v804_v38 = vld [vmem:[#allocation7 + $0x3f8] sm:$0xff] }
 0x299   :  { %2465 = vmatpush1.bf16.msra.mxu1 %v3796_v0  ;;  %v3852_v0 = vcombine.low %v879_v48, %v883_v49  ;;  %v808_v48 = vld [vmem:[#allocation7 + $0x418] sm:$0xff] }
 0x29a   :  { %2506 = vmatpush1.bf16.msra.mxu0 %v3670_v1  ;;  %2466 = vmatprep.subr.bf16.mxu1 %v3805_v2  ;;  %v3726_v1 = vcombine.low %v752_v50, %v756_v51  ;;  %v3861_v2 = vcombine.high %v887_v58, %v891_v59  ;;  %v812_v49 = vld [vmem:[#allocation7 + $0x438] sm:$0xff]  ;;  %v3900_v50 = vcombine.low %v927_v36, %v931_v37 }
 0x29b   :  { %2507 = vmatprep.subr.bf16.mxu0 %v3679_v3  ;;  %v3735_v3 = vcombine.high %v760_v62, %v764_v63  ;;  %v3774_v51 = vcombine.low %v800_v42, %v804_v38 }
 0x29d   :  { %2467 = vmatpush1.bf16.msra.mxu1 %v3804_v10  ;;  %v3860_v10 = vcombine.low %v887_v58, %v891_v59  ;;  %v4184_v58 = vld [vmem:[#allocation8] ss:$8 sps:$4 sm:$0xff]   ;;  %v3782_v59 = vcombine.low %v808_v48, %v812_v49 }
 0x29e   :  { %2508 = vmatpush1.bf16.msra.mxu0 %v3678_v11  ;;  %2468 = vmatprep.subr.bf16.mxu1 %v3813_v12  ;;  %v3734_v11 = vcombine.low %v760_v62, %v764_v63  ;;  %v3869_v12 = vcombine.high %v895_v6, %v899_v7  ;;  %v4189_v63 = vld [vmem:[#allocation8 + $0x14] ss:$8 sps:$4 sm:$0xff]  }
 0x29f   :  { %2509 = vmatprep.subr.bf16.mxu0 %v3687_v13  ;;  %v3743_v13 = vcombine.high %v768_v60, %v772_v9 }
 0x2a1   :  { %2469 = vmatpush1.bf16.msra.mxu1 %v3812_v15  ;;  %v3868_v15 = vcombine.low %v895_v6, %v899_v7  ;;  %v4192_v6 = vld [vmem:[#allocation8 + $0x24] ss:$8 sps:$4 sm:$0xff]  }
 0x2a2   :  { %2510 = vmatpush1.bf16.msra.mxu0 %v3686_v45  ;;  %2470 = vmatprep.subr.bf16.mxu1 %v3821_v16  ;;  %v3742_v45 = vcombine.low %v768_v60, %v772_v9  ;;  %v3877_v16 = vcombine.high %v903_v14, %v907_v4  ;;  %v832_v60 = vld [vmem:[#allocation7 + $0x4d8] sm:$0xff] }
 0x2a3   :  { %2511 = vmatprep.subr.bf16.mxu0 %v3695_v17  ;;  %v3751_v17 = vcombine.high %v776_v5, %v780_v8  ;;  %v836_v9 = vld [vmem:[#allocation7 + $0x4f8] sm:$0xff] }
 0x2a5   :  { %2471 = vmatpush1.bf16.msra.mxu1 %v3820_v24  ;;  %v3876_v24 = vcombine.low %v903_v14, %v907_v4  ;;  %v844_v14 = vld [vmem:[#allocation7 + $0x538] sm:$0xff] }
 0x2a6   :  { %2512 = vmatpush1.bf16.msra.mxu0 %v3694_v25  ;;  %2472 = vmatprep.subr.bf16.mxu1 %v3829_v26  ;;  %v3750_v25 = vcombine.low %v776_v5, %v780_v8  ;;  %v3885_v26 = vcombine.high %v911_v18, %v915_v19  ;;  %v4193_v4 = vld [vmem:[#allocation8 + $0x30] ss:$8 sps:$4 sm:$0xff]   ;;  %v4198_v5 = vld [vmem:[#allocation8 + $0x44] ss:$8 sps:$4 sm:$0xff]  }
 0x2a7   :  { %2513 = vmatprep.subr.bf16.mxu0 %v3703_v27  ;;  %v3759_v27 = vcombine.high %v784_v20, %v788_v22 }
 0x2a9   :  { %2473 = vmatpush1.bf16.msra.mxu1 %v3828_v32  ;;  %v3884_v32 = vcombine.low %v911_v18, %v915_v19  ;;  %v4201_v18 = vld [vmem:[#allocation8 + $0x54] ss:$8 sps:$4 sm:$0xff]  }
 0x2aa   :  { %2514 = vmatpush1.bf16.msra.mxu0 %v3702_v33  ;;  %2474 = vmatprep.subr.bf16.mxu1 %v3837_v34  ;;  %v3758_v33 = vcombine.low %v784_v20, %v788_v22  ;;  %v3893_v34 = vcombine.high %v919_v28, %v923_v29  ;;  %v856_v20 = vld [vmem:[#allocation7 + $0x598] sm:$0xff] }
 0x2ab   :  { %2515 = vmatprep.subr.bf16.mxu0 %v3711_v35  ;;  %v3767_v35 = vcombine.high %v792_v30, %v796_v31  ;;  %v860_v22 = vld [vmem:[#allocation7 + $0x5b8] sm:$0xff] }
 0x2ad   :  { %2475 = vmatpush1.bf16.msra.mxu1 %v3836_v39  ;;  %v3892_v39 = vcombine.low %v919_v28, %v923_v29  ;;  %v3831_v28 = vcombine.high %v856_v20, %v860_v22 }
 0x2ae   :  { %2516 = vmatpush1.bf16.msra.mxu0 %v3710_v44  ;;  %2476 = vmatprep.subr.bf16.mxu1 %v3845_v46  ;;  %v3766_v44 = vcombine.low %v792_v30, %v796_v31  ;;  %v3901_v46 = vcombine.high %v927_v36, %v931_v37  ;;  %v864_v30 = vld [vmem:[#allocation7 + $0x5d8] sm:$0xff] }
 0x2af   :  { %2517 = vmatprep.subr.bf16.mxu0 %v3719_v47  ;;  %v3775_v47 = vcombine.high %v800_v42, %v804_v38  ;;  %v868_v31 = vld [vmem:[#allocation7 + $0x5f8] sm:$0xff] }
 0x2b0   :  { %v4207_v36 = vld [vmem:[#allocation8 + $0x74] ss:$8 sps:$4 sm:$0xff]   ;;  %v3839_v37 = vcombine.high %v864_v30, %v868_v31 }
 0x2b1   :  { %2477 = vmatpush1.bf16.msra.mxu1 %v3844_v52  ;;  %v4186_v52 = vld [vmem:[#allocation8 + $0x4] ss:$8 sps:$4 sm:$0xff]   ;;  %v872_v42 = vld [vmem:[#allocation7 + $0x618] sm:$0xff] }
 0x2b2   :  { %2518 = vmatpush1.bf16.msra.mxu0 %v3718_v53  ;;  %2478 = vmatprep.subr.bf16.mxu1 %v3853_v56  ;;  %v3783_v53 = vcombine.high %v808_v48, %v812_v49  ;;  %v816_v56 = vld [vmem:[#allocation7 + $0x458] sm:$0xff] }
 0x2b3   :  { %2519 = vmatprep.subr.bf16.mxu0 %v3727_v57  ;;  %v820_v57 = vld [vmem:[#allocation7 + $0x478] sm:$0xff] }
 0x2b4   :  { %v3791_v62 = vcombine.high %v816_v56, %v820_v57  ;;  %v876_v38 = vld [vmem:[#allocation7 + $0x638] sm:$0xff] }
 0x2b5   :  { %2479 = vmatpush1.bf16.msra.mxu1 %v3852_v0  ;;  %v824_v0 = vld [vmem:[#allocation7 + $0x498] sm:$0xff] }
 0x2b6   :  { %2520 = vmatpush1.bf16.msra.mxu0 %v3726_v1  ;;  %2480 = vmatprep.subr.bf16.mxu1 %v3861_v2  ;;  %v828_v1 = vld [vmem:[#allocation7 + $0x4b8] sm:$0xff] }
 0x2b7   :  { %2521 = vmatprep.subr.bf16.mxu0 %v3735_v3  ;;  %v4187_v2 = vld [vmem:[#allocation8 + $0x10] ss:$8 sps:$4 sm:$0xff]   ;;  %v3790_v3 = vcombine.low %v816_v56, %v820_v57  ;;  %v3799_v7 = vcombine.high %v824_v0, %v828_v1 }
 0x2b8   :  { %v880_v48 = vld [vmem:[#allocation7 + $0x658] sm:$0xff] }
 0x2b9   :  { %2481 = vmatpush1.bf16.msra.mxu1 %v3860_v10  ;;  %v4190_v10 = vld [vmem:[#allocation8 + $0x20] ss:$8 sps:$4 sm:$0xff]   ;;  %v884_v49 = vld [vmem:[#allocation7 + $0x678] sm:$0xff] }
 0x2ba   :  { %2522 = vmatpush1.bf16.msra.mxu0 %v3734_v11  ;;  %2482 = vmatprep.subr.bf16.mxu1 %v3869_v12  ;;  %v3798_v11 = vcombine.low %v824_v0, %v828_v1  ;;  %v4195_v12 = vld [vmem:[#allocation8 + $0x34] ss:$8 sps:$4 sm:$0xff]  }
 0x2bb   :  { %2523 = vmatprep.subr.bf16.mxu0 %v3743_v13  ;;  %v840_v13 = vld [vmem:[#allocation7 + $0x518] sm:$0xff] }
 0x2bc   :  { %v3815_v8 = vcombine.high %v840_v13, %v844_v14  ;;  %v888_v56 = vld [vmem:[#allocation7 + $0x698] sm:$0xff] }
 0x2bd   :  { %2483 = vmatpush1.bf16.msra.mxu1 %v3868_v15  ;;  %v848_v15 = vld [vmem:[#allocation7 + $0x558] sm:$0xff] }
 0x2be   :  { %2524 = vmatpush1.bf16.msra.mxu0 %v3742_v45  ;;  %2484 = vmatprep.subr.bf16.mxu1 %v3877_v16  ;;  %v852_v45 = vld [vmem:[#allocation7 + $0x578] sm:$0xff]  ;;  %v4196_v16 = vld [vmem:[#allocation8 + $0x40] ss:$8 sps:$4 sm:$0xff]  }
 0x2bf   :  { %2525 = vmatprep.subr.bf16.mxu0 %v3751_v17  ;;  %v3814_v17 = vcombine.low %v840_v13, %v844_v14  ;;  %v3823_v19 = vcombine.high %v848_v15, %v852_v45  ;;  %v892_v57 = vld [vmem:[#allocation7 + $0x6b8] sm:$0xff] }
 0x2c0   :  { %v896_v0 = vld [vmem:[#allocation7 + $0x6d8] sm:$0xff] }
 0x2c1   :  { %2485 = vmatpush1.bf16.msra.mxu1 %v3876_v24  ;;  %v4199_v24 = vld [vmem:[#allocation8 + $0x50] ss:$8 sps:$4 sm:$0xff]  }
 0x2c2   :  { %2526 = vmatpush1.bf16.msra.mxu0 %v3750_v25  ;;  %2486 = vmatprep.subr.bf16.mxu1 %v3885_v26  ;;  %v3822_v25 = vcombine.low %v848_v15, %v852_v45  ;;  %v4204_v26 = vld [vmem:[#allocation8 + $0x64] ss:$8 sps:$4 sm:$0xff]   ;;  %v900_v1 = vld [vmem:[#allocation7 + $0x6f8] sm:$0xff] }
 0x2c3   :  { %2527 = vmatprep.subr.bf16.mxu0 %v3759_v27  ;;  %v912_v13 = vld [vmem:[#allocation7 + $0x758] sm:$0xff] }
 0x2c4   :  { %v916_v14 = vld [vmem:[#allocation7 + $0x778] sm:$0xff] }
 0x2c5   :  { %2487 = vmatpush1.bf16.msra.mxu1 %v3884_v32  ;;  %v920_v15 = vld [vmem:[#allocation7 + $0x798] sm:$0xff] }
 0x2c6   :  { %2528 = vmatpush1.bf16.msra.mxu0 %v3758_v33  ;;  %2488 = vmatprep.subr.bf16.mxu1 %v3893_v34  ;;  %v4202_v33 = vld [vmem:[#allocation8 + $0x60] ss:$8 sps:$4 sm:$0xff]   ;;  %v924_v45 = vld [vmem:[#allocation7 + $0x7b8] sm:$0xff] }
 0x2c7   :  { %2529 = vmatprep.subr.bf16.mxu0 %v3767_v35  ;;  %v3830_v35 = vcombine.low %v856_v20, %v860_v22  ;;  %v928_v20 = vld [vmem:[#allocation7 + $0x7d8] sm:$0xff] }
 0x2c8   :  { %v932_v22 = vld [vmem:[#allocation7 + $0x7f8] sm:$0xff] }
 0x2c9   :  { %2489 = vmatpush1.bf16.msra.mxu1 %v3892_v39  ;;  %v4205_v39 = vld [vmem:[#allocation8 + $0x70] ss:$8 sps:$4 sm:$0xff]  }
 0x2ca   :  { %2530 = vmatpush1.bf16.msra.mxu0 %v3766_v44  ;;  %2490 = vmatprep.subr.bf16.mxu1 %v3901_v46  ;;  %v3838_v44 = vcombine.low %v864_v30, %v868_v31  ;;  %v4210_v46 = vld [vmem:[#allocation8 + $0x84] ss:$8 sps:$4 sm:$0xff]   ;;  %v4229_v30 = vld [vmem:[#allocation8 + $0xf0] ss:$8 sps:$4 sm:$0xff]   ;;  %v3902_v31 = vcombine.low %v928_v20, %v932_v22 }
 0x2cb   :  { %2531 = vmatprep.subr.bf16.mxu0 %v3775_v47  ;;  %v3847_v47 = vcombine.high %v872_v42, %v876_v38 }
 0x2cd   :  { %2491 = vmatpush1.bf16.msra.mxu1 %v3900_v50  ;;  %v4208_v50 = vld [vmem:[#allocation8 + $0x80] ss:$8 sps:$4 sm:$0xff]  }
 0x2ce   :  { %2532 = vmatpush1.bf16.msra.mxu0 %v3774_v51  ;;  %3387 = vmatprep.subr.bf16.mxu1 %v4186_v52  ;;  %v3846_v51 = vcombine.low %v872_v42, %v876_v38  ;;  %v4213_v52 = vld [vmem:[#allocation8 + $0x94] ss:$8 sps:$4 sm:$0xff]  }
 0x2cf   :  { %2542 = vmatprep.subr.bf16.mxu0 %v3783_v53  ;;  %v3855_v53 = vcombine.high %v880_v48, %v884_v49 }
 0x2d0   :  { %2493 = vmatmul.mubr.bf16.vlgmr.msra.gmra.mrb[4].mxu1 %v4679_v23 }
 0x2d1   :  { %2534 = vmatmul.mubr.bf16.vlgmr.msra.gmra.mrb[20].mxu0 %v4661_v61  ;;  %3388 = vmatpush1.bf16.msra.mxu1 %v4184_v58  ;;  %v3807_v61 = vcombine.high %v832_v60, %v836_v9  ;;  %v4211_v58 = vld [vmem:[#allocation8 + $0x90] ss:$8 sps:$4 sm:$0xff]  }
 0x2d2   :  { %2543 = vmatpush1.bf16.msra.mxu0 %v3782_v59  ;;  %2574 = vmatprep.mubr.bf16.mxu0 %v4677_v21  ;;  %v3806_v21 = vcombine.low %v832_v60, %v836_v9  ;;  %v3854_v59 = vcombine.low %v880_v48, %v884_v49  ;;  %v904_v60 = vld [vmem:[#allocation7 + $0x718] sm:$0xff] }
 0x2d3   :  { %2544 = vmatprep.subr.bf16.mxu0 %v3791_v62  ;;  %3389 = vmatprep.subr.bf16.mxu1 %v4189_v63  ;;  %v4216_v62 = vld [vmem:[#allocation8 + $0xa4] ss:$8 sps:$4 sm:$0xff]   ;;  %v3863_v63 = vcombine.high %v888_v56, %v892_v57  ;;  %v908_v9 = vld [vmem:[#allocation7 + $0x738] sm:$0xff] }
 0x2d5   :  { %3390 = vmatpush1.bf16.msra.mxu1 %v4187_v2  ;;  %v4214_v2 = vld [vmem:[#allocation8 + $0xa0] ss:$8 sps:$4 sm:$0xff]  }
 0x2d6   :  { %2545 = vmatpush1.bf16.msra.mxu0 %v3790_v3  ;;  %3391 = vmatprep.subr.bf16.mxu1 %v4192_v6  ;;  %v3862_v3 = vcombine.low %v888_v56, %v892_v57  ;;  %v4219_v6 = vld [vmem:[#allocation8 + $0xb4] ss:$8 sps:$4 sm:$0xff]   ;;  %v4238_v57 = vld [vmem:[#allocation8 + $0x120] ss:$8 sps:$4 sm:$0xff]  }
 0x2d7   :  { %2546 = vmatprep.subr.bf16.mxu0 %v3799_v7  ;;  %v3871_v7 = vcombine.high %v896_v0, %v900_v1  ;;  %v4237_v56 = vld [vmem:[#allocation8 + $0x114] ss:$8 sps:$4 sm:$0xff]  }
 0x2d9   :  { %3392 = vmatpush1.bf16.msra.mxu1 %v4190_v10  ;;  %v4217_v10 = vld [vmem:[#allocation8 + $0xb0] ss:$8 sps:$4 sm:$0xff]  }
 0x2da   :  { %2547 = vmatpush1.bf16.msra.mxu0 %v3798_v11  ;;  %3393 = vmatprep.subr.bf16.mxu1 %v4195_v12  ;;  %v3870_v11 = vcombine.low %v896_v0, %v900_v1  ;;  %v4222_v12 = vld [vmem:[#allocation8 + $0xc4] ss:$8 sps:$4 sm:$0xff]   ;;  %v4249_v0 = vld [vmem:[#allocation8 + $0x154] ss:$8 sps:$4 sm:$0xff]   ;;  %v4247_v1 = vld [vmem:[#allocation8 + $0x150] ss:$8 sps:$4 sm:$0xff]  }
 0x2db   :  { %2548 = vmatprep.subr.bf16.mxu0 %v3807_v61  ;;  %v3879_v61 = vcombine.high %v904_v60, %v908_v9 }
 0x2dd   :  { %3394 = vmatpush1.bf16.msra.mxu1 %v4193_v4  ;;  %v4220_v4 = vld [vmem:[#allocation8 + $0xc0] ss:$8 sps:$4 sm:$0xff]  }
 0x2de   :  { %2549 = vmatpush1.bf16.msra.mxu0 %v3806_v21  ;;  %3395 = vmatprep.subr.bf16.mxu1 %v4198_v5  ;;  %v3878_v21 = vcombine.low %v904_v60, %v908_v9  ;;  %v4225_v5 = vld [vmem:[#allocation8 + $0xd4] ss:$8 sps:$4 sm:$0xff]   ;;  %v4258_v60 = vld [vmem:[#allocation8 + $0x184] ss:$8 sps:$4 sm:$0xff]   ;;  %v4256_v9 = vld [vmem:[#allocation8 + $0x180] ss:$8 sps:$4 sm:$0xff]  }
 0x2df   :  { %2550 = vmatprep.subr.bf16.mxu0 %v3815_v8  ;;  %v3887_v8 = vcombine.high %v912_v13, %v916_v14 }
 0x2e1   :  { %3396 = vmatpush1.bf16.msra.mxu1 %v4196_v16  ;;  %v4223_v16 = vld [vmem:[#allocation8 + $0xd0] ss:$8 sps:$4 sm:$0xff]  }
 0x2e2   :  { %2551 = vmatpush1.bf16.msra.mxu0 %v3814_v17  ;;  %3397 = vmatprep.subr.bf16.mxu1 %v4201_v18  ;;  %v3886_v17 = vcombine.low %v912_v13, %v916_v14  ;;  %v4228_v18 = vld [vmem:[#allocation8 + $0xe4] ss:$8 sps:$4 sm:$0xff]   ;;  %v4267_v13 = vld [vmem:[#allocation8 + $0x1b4] ss:$8 sps:$4 sm:$0xff]   ;;  %v4265_v14 = vld [vmem:[#allocation8 + $0x1b0] ss:$8 sps:$4 sm:$0xff]  }
 0x2e3   :  { %v4696_v27 = vpop.f32.mrb[12].mxu0  ;;  %2552 = vmatprep.subr.bf16.mxu0 %v3823_v19  ;;  %v3895_v19 = vcombine.high %v920_v15, %v924_v45 }
 0x2e4   :  { %v4698_v29 = vpop.f32.mrb[13].mxu0 }
 0x2e5   :  { %v2293_v32 = vpop.f32.mrb[14].mxu0  ;;  %3398 = vmatpush1.bf16.msra.mxu1 %v4199_v24  ;;  %v4226_v24 = vld [vmem:[#allocation8 + $0xe0] ss:$8 sps:$4 sm:$0xff]  }
 0x2e6   :  { %2553 = vmatpush1.bf16.msra.mxu0 %v3822_v25  ;;  %v2294_v34 = vpop.f32.mrb[15].mxu0  ;;  %3399 = vmatprep.subr.bf16.mxu1 %v4204_v26  ;;  %v3894_v25 = vcombine.low %v920_v15, %v924_v45  ;;  %v4231_v26 = vld [vmem:[#allocation8 + $0xf4] ss:$8 sps:$4 sm:$0xff]   ;;  %v4234_v32 = vld [vmem:[#allocation8 + $0x104] ss:$8 sps:$4 sm:$0xff]  }
 0x2e7   :  { %2554 = vmatprep.subr.bf16.mxu0 %v3831_v28  ;;  %v3903_v28 = vcombine.high %v928_v20, %v932_v22  ;;  %v4276_v45 = vld [vmem:[#allocation8 + $0x1e4] ss:$8 sps:$4 sm:$0xff]   ;;  %v4279_v22 = vld [vmem:[#allocation8 + $0x1f4] ss:$8 sps:$4 sm:$0xff]  }
 0x2e9   :  { %3400 = vmatpush1.bf16.msra.mxu1 %v4202_v33  ;;  %v4704_v33 = vld [vmem:[%s4749_s6] sm:$0xff] }
 0x2ea   :  { %2555 = vmatpush1.bf16.msra.mxu0 %v3830_v35  ;;  %3401 = vmatprep.subr.bf16.mxu1 %v4207_v36  ;;  %v938_v34 = vrot.slane %v4704_v33, %v4620_v41  ;;  %v942_v35 = vrot.slane %v4704_v33, %v4626_v43  ;;  %v946_v15 = vrot.slane %v4704_v33, %v253_v54 }
 0x2eb   :  { %2556 = vmatprep.subr.bf16.mxu0 %v3839_v37 }
 0x2ec   :  { %v2290_v36 = vadd.f32 %v4696_v27, %v938_v34  ;;  %v2292_v37 = vadd.f32 %v4698_v29, %v942_v35  ;;  %v4235_v27 = vld [vmem:[#allocation8 + $0x110] ss:$8 sps:$4 sm:$0xff]   ;;  %v4240_v29 = vld [vmem:[#allocation8 + $0x124] ss:$8 sps:$4 sm:$0xff]  }
 0x2ed   :  { %3402 = vmatpush1.bf16.msra.mxu1 %v4205_v39 }
 0x2ee   :  { %2557 = vmatpush1.bf16.msra.mxu0 %v3838_v44  ;;  %3403 = vmatprep.subr.bf16.mxu1 %v4210_v46 }
 0x2ef   :  { %2558 = vmatprep.subr.bf16.mxu0 %v3847_v47 }
 0x2f1   :  { %3404 = vmatpush1.bf16.msra.mxu1 %v4208_v50 }
 0x2f2   :  { %2559 = vmatpush1.bf16.msra.mxu0 %v3846_v51  ;;  %3405 = vmatprep.subr.bf16.mxu1 %v4213_v52  ;;  %v4232_v52 = vld [vmem:[#allocation8 + $0x100] ss:$8 sps:$4 sm:$0xff]  }
 0x2f3   :  { %2560 = vmatprep.subr.bf16.mxu0 %v3855_v53 }
 0x2f5   :  { %3406 = vmatpush1.bf16.msra.mxu1 %v4211_v58  ;;  %v4243_v58 = vld [vmem:[#allocation8 + $0x134] ss:$8 sps:$4 sm:$0xff]  }
 0x2f6   :  { %2561 = vmatpush1.bf16.msra.mxu0 %v3854_v59  ;;  %3407 = vmatprep.subr.bf16.mxu1 %v4216_v62  ;;  %v4241_v59 = vld [vmem:[#allocation8 + $0x130] ss:$8 sps:$4 sm:$0xff]   ;;  %v4246_v62 = vld [vmem:[#allocation8 + $0x144] ss:$8 sps:$4 sm:$0xff]  }
 0x2f7   :  { %2562 = vmatprep.subr.bf16.mxu0 %v3863_v63  ;;  %v4244_v63 = vld [vmem:[#allocation8 + $0x140] ss:$8 sps:$4 sm:$0xff]  }
 0x2f9   :  { %3408 = vmatpush1.bf16.msra.mxu1 %v4214_v2  ;;  %v4252_v2 = vld [vmem:[#allocation8 + $0x164] ss:$8 sps:$4 sm:$0xff]  }
 0x2fa   :  { %2563 = vmatpush1.bf16.msra.mxu0 %v3862_v3  ;;  %3409 = vmatprep.subr.bf16.mxu1 %v4219_v6  ;;  %v4250_v3 = vld [vmem:[#allocation8 + $0x160] ss:$8 sps:$4 sm:$0xff]   ;;  %v4255_v6 = vld [vmem:[#allocation8 + $0x174] ss:$8 sps:$4 sm:$0xff]  }
 0x2fb   :  { %2564 = vmatprep.subr.bf16.mxu0 %v3871_v7  ;;  %v4253_v7 = vld [vmem:[#allocation8 + $0x170] ss:$8 sps:$4 sm:$0xff]  }
 0x2fd   :  { %3410 = vmatpush1.bf16.msra.mxu1 %v4217_v10  ;;  %v4261_v10 = vld [vmem:[#allocation8 + $0x194] ss:$8 sps:$4 sm:$0xff]  }
 0x2fe   :  { %2565 = vmatpush1.bf16.msra.mxu0 %v3870_v11  ;;  %3411 = vmatprep.subr.bf16.mxu1 %v4222_v12  ;;  %v4259_v11 = vld [vmem:[#allocation8 + $0x190] ss:$8 sps:$4 sm:$0xff]   ;;  %v4264_v12 = vld [vmem:[#allocation8 + $0x1a4] ss:$8 sps:$4 sm:$0xff]  }
 0x2ff   :  { %2566 = vmatprep.subr.bf16.mxu0 %v3879_v61  ;;  %v4262_v61 = vld [vmem:[#allocation8 + $0x1a0] ss:$8 sps:$4 sm:$0xff]  }
 0x301   :  { %3412 = vmatpush1.bf16.msra.mxu1 %v4220_v4  ;;  %v4270_v4 = vld [vmem:[#allocation8 + $0x1c4] ss:$8 sps:$4 sm:$0xff]  }
 0x302   :  { %2567 = vmatpush1.bf16.msra.mxu0 %v3878_v21  ;;  %3413 = vmatprep.subr.bf16.mxu1 %v4225_v5  ;;  %v4268_v21 = vld [vmem:[#allocation8 + $0x1c0] ss:$8 sps:$4 sm:$0xff]   ;;  %v4273_v5 = vld [vmem:[#allocation8 + $0x1d4] ss:$8 sps:$4 sm:$0xff]  }
 0x303   :  { %2568 = vmatprep.subr.bf16.mxu0 %v3887_v8  ;;  %v4271_v8 = vld [vmem:[#allocation8 + $0x1d0] ss:$8 sps:$4 sm:$0xff]  }
 0x305   :  { %3414 = vmatpush1.bf16.msra.mxu1 %v4223_v16  ;;  %v950_v16 = vrot.slane %v4704_v33, %v257_v55  ;;  %v4280_v55 = vld [vmem:[#allocation8 + $0x200] ss:$8 sps:$4 sm:$0xff]  }
 0x306   :  { %2569 = vmatpush1.bf16.msra.mxu0 %v3886_v17  ;;  %3415 = vmatprep.subr.bf16.mxu1 %v4228_v18  ;;  %v4274_v18 = vld [vmem:[#allocation8 + $0x1e0] ss:$8 sps:$4 sm:$0xff]  }
 0x307   :  { %2570 = vmatprep.subr.bf16.mxu0 %v3895_v19 }
 0x309   :  { %3416 = vmatpush1.bf16.msra.mxu1 %v4226_v24 }
 0x30a   :  { %2571 = vmatpush1.bf16.msra.mxu0 %v3894_v25  ;;  %3417 = vmatprep.subr.bf16.mxu1 %v4231_v26 }
 0x30b   :  { %2572 = vmatprep.subr.bf16.mxu0 %v3903_v28 }
 0x30d   :  { %3418 = vmatpush1.bf16.msra.mxu1 %v4229_v30 }
 0x30e   :  { %2573 = vmatpush1.bf16.msra.mxu0 %v3902_v31  ;;  %3428 = vmatprep.subr.bf16.mxu1 %v4234_v32  ;;  %v4277_v31 = vld [vmem:[#allocation8 + $0x1f0] ss:$8 sps:$4 sm:$0xff]   ;;  %v4282_v32 = vld [vmem:[#allocation8 + $0x204] ss:$8 sps:$4 sm:$0xff]  }
 0x311   :  { %2575 = vmatmul.mubr.bf16.vlgmr.msra.gmra.mrb[20].mxu0 %v4679_v23 }
 0x323   :  { %v2330_v42 = vpop.f32.mrb[0].mxu1 }
 0x324   :  { %v2331_v38 = vadd.f32 %v2330_v42, %v2290_v36  ;;  %v2332_v39 = vpop.f32.mrb[1].mxu1  ;;  %v4283_v42 = vld [vmem:[#allocation8 + $0x210] ss:$8 sps:$4 sm:$0xff]  }
 0x325   :  { %v2333_v44 = vadd.f32 %v2332_v39, %v2292_v37  ;;  %v2334_v23 = vpop.f32.mrb[2].mxu1  ;;  %v4285_v37 = vld [vmem:[#allocation8 + $0x214] ss:$8 sps:$4 sm:$0xff]   ;;  %v4286_v39 = vld [vmem:[#allocation8 + $0x220] ss:$8 sps:$4 sm:$0xff]  }
 0x326   :  { %v2583_v46 = vmul.f32 0.2, %v2331_v38  ;;  %v2335_v47 = vpop.f32.mrb[3].mxu1  ;;  %v4289_v23 = vld [vmem:[#allocation8 + $0x230] ss:$8 sps:$4 sm:$0xff]  }
 0x327   :  { %v2584_v48 = vmul.f32 0.2, %v2333_v44  ;;  %v4292_v47 = vld [vmem:[#allocation8 + $0x240] ss:$8 sps:$4 sm:$0xff]  }
 0x328   :  { %v2591_v49 = vmax.f32 %v2331_v38, %v2583_v46  ;;  %v4288_v38 = vld [vmem:[#allocation8 + $0x224] ss:$8 sps:$4 sm:$0xff]  }
 0x329   :  { %v2592_v50 = vmax.f32 %v2333_v44, %v2584_v48  ;;  %v4291_v44 = vld [vmem:[#allocation8 + $0x234] ss:$8 sps:$4 sm:$0xff]   ;;  %v4294_v46 = vld [vmem:[#allocation8 + $0x244] ss:$8 sps:$4 sm:$0xff]  }
 0x32a   :  { %v2599_v53 = vpack.c.bf16 %v2591_v49, %v2591_v49  ;;  %v4297_v48 = vld [vmem:[#allocation8 + $0x254] ss:$8 sps:$4 sm:$0xff]   ;;  %v4295_v49 = vld [vmem:[#allocation8 + $0x250] ss:$8 sps:$4 sm:$0xff]  }
 0x32b   :  { %v2600_v51 = vpack.c.bf16 %v2592_v50, %v2592_v50  ;;  %v4300_v50 = vld [vmem:[#allocation8 + $0x264] ss:$8 sps:$4 sm:$0xff]  }
 0x32d   :  { %3419 = vmatprep.mubr.bf16.mxu1 %v2600_v51  ;;  %v4298_v51 = vld [vmem:[#allocation8 + $0x260] ss:$8 sps:$4 sm:$0xff]  }
 0x32e   :  { %3420 = vmatmul.mubr.bf16.vlgmr.msra.gmra.mrb[8].mxu1 %v2599_v53  ;;  %v4301_v53 = vld [vmem:[#allocation8 + $0x270] ss:$8 sps:$4 sm:$0xff]  }
 0x32f   :  { %3429 = vmatpush1.bf16.msra.mxu1 %v4232_v52  ;;  %v4303_v52 = vld [vmem:[#allocation8 + $0x274] ss:$8 sps:$4 sm:$0xff]  }
 0x330   :  { %3430 = vmatprep.subr.bf16.mxu1 %v4237_v56  ;;  %v4306_v56 = vld [vmem:[#allocation8 + $0x284] ss:$8 sps:$4 sm:$0xff]  }
 0x333   :  { %3431 = vmatpush1.bf16.msra.mxu1 %v4235_v27  ;;  %v4304_v27 = vld [vmem:[#allocation8 + $0x280] ss:$8 sps:$4 sm:$0xff]  }
 0x334   :  { %3432 = vmatprep.subr.bf16.mxu1 %v4240_v29  ;;  %v4309_v29 = vld [vmem:[#allocation8 + $0x294] ss:$8 sps:$4 sm:$0xff]  }
 0x337   :  { %3433 = vmatpush1.bf16.msra.mxu1 %v4238_v57  ;;  %v4307_v57 = vld [vmem:[#allocation8 + $0x290] ss:$8 sps:$4 sm:$0xff]  }
 0x338   :  { %3434 = vmatprep.subr.bf16.mxu1 %v4243_v58  ;;  %v4312_v58 = vld [vmem:[#allocation8 + $0x2a4] ss:$8 sps:$4 sm:$0xff]  }
 0x33b   :  { %3435 = vmatpush1.bf16.msra.mxu1 %v4241_v59  ;;  %v4310_v59 = vld [vmem:[#allocation8 + $0x2a0] ss:$8 sps:$4 sm:$0xff]  }
 0x33c   :  { %3436 = vmatprep.subr.bf16.mxu1 %v4246_v62  ;;  %v4315_v62 = vld [vmem:[#allocation8 + $0x2b4] ss:$8 sps:$4 sm:$0xff]  }
 0x33f   :  { %3437 = vmatpush1.bf16.msra.mxu1 %v4244_v63  ;;  %v4313_v63 = vld [vmem:[#allocation8 + $0x2b0] ss:$8 sps:$4 sm:$0xff]  }
 0x340   :  { %3438 = vmatprep.subr.bf16.mxu1 %v4249_v0  ;;  %v4318_v0 = vld [vmem:[#allocation8 + $0x2c4] ss:$8 sps:$4 sm:$0xff]  }
 0x343   :  { %3439 = vmatpush1.bf16.msra.mxu1 %v4247_v1  ;;  %v4316_v1 = vld [vmem:[#allocation8 + $0x2c0] ss:$8 sps:$4 sm:$0xff]  }
 0x344   :  { %3440 = vmatprep.subr.bf16.mxu1 %v4252_v2  ;;  %v4321_v2 = vld [vmem:[#allocation8 + $0x2d4] ss:$8 sps:$4 sm:$0xff]  }
 0x347   :  { %3441 = vmatpush1.bf16.msra.mxu1 %v4250_v3  ;;  %v953_v3 = vsub.s32 4, %v4617_v40 }
 0x348   :  { %3442 = vmatprep.subr.bf16.mxu1 %v4255_v6  ;;  %v957_v6 = vsub.s32 5, %v4617_v40 }
 0x34b   :  { %3443 = vmatpush1.bf16.msra.mxu1 %v4253_v7  ;;  %v4319_v7 = vld [vmem:[#allocation8 + $0x2d0] ss:$8 sps:$4 sm:$0xff]  }
 0x34c   :  { %3444 = vmatprep.subr.bf16.mxu1 %v4258_v60  ;;  %v954_v60 = vrot.slane %v4704_v33, %v953_v3 }
 0x34f   :  { %3445 = vmatpush1.bf16.msra.mxu1 %v4256_v9  ;;  %v4324_v9 = vld [vmem:[#allocation8 + $0x2e4] ss:$8 sps:$4 sm:$0xff]  }
 0x350   :  { %3446 = vmatprep.subr.bf16.mxu1 %v4261_v10  ;;  %v958_v10 = vrot.slane %v4704_v33, %v957_v6 }
 0x353   :  { %3447 = vmatpush1.bf16.msra.mxu1 %v4259_v11 }
 0x354   :  { %3448 = vmatprep.subr.bf16.mxu1 %v4264_v12  ;;  %v4322_v12 = vld [vmem:[#allocation8 + $0x2e0] ss:$8 sps:$4 sm:$0xff]  }
 0x357   :  { %3449 = vmatpush1.bf16.msra.mxu1 %v4262_v61 }
 0x358   :  { %3450 = vmatprep.subr.bf16.mxu1 %v4267_v13 }
 0x35b   :  { %3451 = vmatpush1.bf16.msra.mxu1 %v4265_v14  ;;  %v4327_v14 = vld [vmem:[#allocation8 + $0x2f4] ss:$8 sps:$4 sm:$0xff]  }
 0x35c   :  { %3452 = vmatprep.subr.bf16.mxu1 %v4270_v4 }
 0x35f   :  { %3453 = vmatpush1.bf16.msra.mxu1 %v4268_v21 }
 0x360   :  { %3454 = vmatprep.subr.bf16.mxu1 %v4273_v5 }
 0x363   :  { %3455 = vmatpush1.bf16.msra.mxu1 %v4271_v8  ;;  %v2412_v17 = vpop.f32.mrb[16].mxu0 }
 0x364   :  { %v4038_v19 = vadd.f32 %v2412_v17, %v946_v15  ;;  %v2414_v20 = vpop.f32.mrb[17].mxu0  ;;  %3456 = vmatprep.subr.bf16.mxu1 %v4276_v45  ;;  %v4325_v45 = vld [vmem:[#allocation8 + $0x2f0] ss:$8 sps:$4 sm:$0xff]   ;;  %v4330_v17 = vld [vmem:[#allocation8 + $0x304] ss:$8 sps:$4 sm:$0xff]  }
 0x365   :  { %v4039_v24 = vadd.f32 %v2414_v20, %v950_v16  ;;  %v2416_v25 = vpop.f32.mrb[18].mxu0  ;;  %v4328_v20 = vld [vmem:[#allocation8 + $0x300] ss:$8 sps:$4 sm:$0xff]  }
 0x366   :  { %v2585_v26 = vmul.f32 0.2, %v4038_v19  ;;  %v2417_v28 = vpop.f32.mrb[19].mxu0  ;;  %v4331_v25 = vld [vmem:[#allocation8 + $0x310] ss:$8 sps:$4 sm:$0xff]  }
 0x367   :  { %v2586_v30 = vmul.f32 0.2, %v4039_v24  ;;  %3457 = vmatpush1.bf16.msra.mxu1 %v4274_v18  ;;  %v4334_v28 = vld [vmem:[#allocation8 + $0x320] ss:$8 sps:$4 sm:$0xff]  }
 0x368   :  { %v2593_v54 = vmax.f32 %v4038_v19, %v2585_v26  ;;  %3458 = vmatprep.subr.bf16.mxu1 %v4279_v22  ;;  %v4336_v26 = vld [vmem:[#allocation8 + $0x324] ss:$8 sps:$4 sm:$0xff]  }
 0x369   :  { %v2594_v34 = vmax.f32 %v4039_v24, %v2586_v30  ;;  %v4333_v24 = vld [vmem:[#allocation8 + $0x314] ss:$8 sps:$4 sm:$0xff]  }
 0x36a   :  { %v2601_v36 = vpack.c.bf16 %v2593_v54, %v2593_v54  ;;  %v4339_v30 = vld [vmem:[#allocation8 + $0x334] ss:$8 sps:$4 sm:$0xff]   ;;  %v4342_v54 = vld [vmem:[#allocation8 + $0x344] ss:$8 sps:$4 sm:$0xff]  }
 0x36b   :  { %v2602_v35 = vpack.c.bf16 %v2594_v34, %v2594_v34  ;;  %3459 = vmatpush1.bf16.msra.mxu1 %v4277_v31  ;;  %v4337_v31 = vld [vmem:[#allocation8 + $0x330] ss:$8 sps:$4 sm:$0xff]   ;;  %v4345_v34 = vld [vmem:[#allocation8 + $0x354] ss:$8 sps:$4 sm:$0xff]  }
 0x36c   :  { %3469 = vmatprep.subr.bf16.mxu1 %v4282_v32  ;;  %v4340_v32 = vld [vmem:[#allocation8 + $0x340] ss:$8 sps:$4 sm:$0xff]  }
 0x36d   :  { %3460 = vmatprep.mubr.bf16.mxu1 %v2602_v35  ;;  %v4343_v35 = vld [vmem:[#allocation8 + $0x350] ss:$8 sps:$4 sm:$0xff]  }
 0x36e   :  { %3461 = vmatmul.mubr.bf16.vlgmr.msra.gmra.mrb[8].mxu1 %v2601_v36  ;;  %v4346_v36 = vld [vmem:[#allocation8 + $0x360] ss:$8 sps:$4 sm:$0xff]  }
 0x36f   :  { %3470 = vmatpush1.bf16.msra.mxu1 %v4280_v55  ;;  %v4348_v55 = vld [vmem:[#allocation8 + $0x364] ss:$8 sps:$4 sm:$0xff]  }
 0x370   :  { %3471 = vmatprep.subr.bf16.mxu1 %v4285_v37  ;;  %v4351_v37 = vld [vmem:[#allocation8 + $0x374] ss:$8 sps:$4 sm:$0xff]  }
 0x373   :  { %3472 = vmatpush1.bf16.msra.mxu1 %v4283_v42  ;;  %v4349_v42 = vld [vmem:[#allocation8 + $0x370] ss:$8 sps:$4 sm:$0xff]  }
 0x374   :  { %3473 = vmatprep.subr.bf16.mxu1 %v4288_v38  ;;  %v4354_v38 = vld [vmem:[#allocation8 + $0x384] ss:$8 sps:$4 sm:$0xff]  }
 0x377   :  { %3474 = vmatpush1.bf16.msra.mxu1 %v4286_v39  ;;  %v4352_v39 = vld [vmem:[#allocation8 + $0x380] ss:$8 sps:$4 sm:$0xff]  }
 0x378   :  { %3475 = vmatprep.subr.bf16.mxu1 %v4291_v44  ;;  %v4357_v44 = vld [vmem:[#allocation8 + $0x394] ss:$8 sps:$4 sm:$0xff]  }
 0x37b   :  { %3476 = vmatpush1.bf16.msra.mxu1 %v4289_v23  ;;  %v4355_v23 = vld [vmem:[#allocation8 + $0x390] ss:$8 sps:$4 sm:$0xff]  }
 0x37c   :  { %3477 = vmatprep.subr.bf16.mxu1 %v4294_v46  ;;  %v4360_v46 = vld [vmem:[#allocation8 + $0x3a4] ss:$8 sps:$4 sm:$0xff]  }
 0x37f   :  { %3478 = vmatpush1.bf16.msra.mxu1 %v4292_v47  ;;  %v4358_v47 = vld [vmem:[#allocation8 + $0x3a0] ss:$8 sps:$4 sm:$0xff]  }
 0x380   :  { %3479 = vmatprep.subr.bf16.mxu1 %v4297_v48  ;;  %v4363_v48 = vld [vmem:[#allocation8 + $0x3b4] ss:$8 sps:$4 sm:$0xff]  }
 0x383   :  { %3480 = vmatpush1.bf16.msra.mxu1 %v4295_v49  ;;  %v4361_v49 = vld [vmem:[#allocation8 + $0x3b0] ss:$8 sps:$4 sm:$0xff]  }
 0x384   :  { %3481 = vmatprep.subr.bf16.mxu1 %v4300_v50  ;;  %v4366_v50 = vld [vmem:[#allocation8 + $0x3c4] ss:$8 sps:$4 sm:$0xff]  }
 0x387   :  { %3482 = vmatpush1.bf16.msra.mxu1 %v4298_v51  ;;  %v4364_v51 = vld [vmem:[#allocation8 + $0x3c0] ss:$8 sps:$4 sm:$0xff]  }
 0x388   :  { %3483 = vmatprep.subr.bf16.mxu1 %v4303_v52  ;;  %v4369_v52 = vld [vmem:[#allocation8 + $0x3d4] ss:$8 sps:$4 sm:$0xff]  }
 0x38b   :  { %3484 = vmatpush1.bf16.msra.mxu1 %v4301_v53  ;;  %v961_v53 = vsub.s32 6, %v4617_v40 }
 0x38c   :  { %3485 = vmatprep.subr.bf16.mxu1 %v4306_v56  ;;  %v965_v56 = vsub.s32 7, %v4617_v40  ;;  %v4373_v40 = vld [vmem:[#allocation8 + $0x3f0] ss:$8 sps:$4 sm:$0xff]  }
 0x38f   :  { %3486 = vmatpush1.bf16.msra.mxu1 %v4304_v27  ;;  %v4367_v27 = vld [vmem:[#allocation8 + $0x3d0] ss:$8 sps:$4 sm:$0xff]  }
 0x390   :  { %3487 = vmatprep.subr.bf16.mxu1 %v4309_v29  ;;  %v4372_v29 = vld [vmem:[#allocation8 + $0x3e4] ss:$8 sps:$4 sm:$0xff]  }
 0x393   :  { %3488 = vmatpush1.bf16.msra.mxu1 %v4307_v57  ;;  %v962_v57 = vrot.slane %v4704_v33, %v961_v53 }
 0x394   :  { %3489 = vmatprep.subr.bf16.mxu1 %v4312_v58  ;;  %v966_v58 = vrot.slane %v4704_v33, %v965_v56 }
 0x397   :  { %3490 = vmatpush1.bf16.msra.mxu1 %v4310_v59  ;;  %v4370_v59 = vld [vmem:[#allocation8 + $0x3e0] ss:$8 sps:$4 sm:$0xff]  }
 0x398   :  { %3491 = vmatprep.subr.bf16.mxu1 %v4315_v62 }
 0x39b   :  { %3492 = vmatpush1.bf16.msra.mxu1 %v4313_v63  ;;  %v4375_v63 = vld [vmem:[#allocation8 + $0x3f4] ss:$8 sps:$4 sm:$0xff]  }
 0x39c   :  { %3493 = vmatprep.subr.bf16.mxu1 %v4318_v0 }
 0x39f   :  { %3494 = vmatpush1.bf16.msra.mxu1 %v4316_v1 }
 0x3a0   :  { %3495 = vmatprep.subr.bf16.mxu1 %v4321_v2 }
 0x3a3   :  { %v2494_v11 = vpop.f32.mrb[4].mxu1  ;;  %3496 = vmatpush1.bf16.msra.mxu1 %v4319_v7 }
 0x3a4   :  { %v4040_v61 = vadd.f32 %v2494_v11, %v954_v60  ;;  %v2496_v13 = vpop.f32.mrb[5].mxu1  ;;  %3497 = vmatprep.subr.bf16.mxu1 %v4324_v9 }
 0x3a5   :  { %v4041_v4 = vadd.f32 %v2496_v13, %v958_v10  ;;  %v2498_v21 = vpop.f32.mrb[6].mxu1 }
 0x3a6   :  { %v2587_v5 = vmul.f32 0.2, %v4040_v61  ;;  %v2499_v8 = vpop.f32.mrb[7].mxu1 }
 0x3a7   :  { %v2588_v15 = vmul.f32 0.2, %v4041_v4  ;;  %3498 = vmatpush1.bf16.msra.mxu1 %v4322_v12  ;;  %v2735_v12 = vld [vmem:[%s4751_s8] sm:$0x3]  ;;  %s4468_s8 = scalar_lea.vmem %s3569_s23, 128 }
 0x3a8   :  { %v2595_v16 = vmax.f32 %v4040_v61, %v2587_v5  ;;  %3499 = vmatprep.subr.bf16.mxu1 %v4327_v14  ;;  %v2740_v61 = vrot.slane %v2735_v12, %v4620_v41  ;;  %v2744_v13 = vrot.slane %v2735_v12, %v4626_v43  ;;  %p4469_p4 = scmp.ne.s32.totalorder %s3569_s23, %s4468_s8  ;;  %p4474_p6 = scmp.lt.s32.totalorder %s4468_s8, %s4468_s8 }
 0x3a9   :  { %v2596_v18 = vmax.f32 %v4041_v4, %v2588_v15 }
 0x3aa   :  { %v2603_v22 = vpack.c.bf16 %v2595_v16, %v2595_v16  ;;  %p4475_p7 = por %p4474_p6, %p4473_p5 }
 0x3ab   :  { %v2604_v19 = vpack.c.bf16 %v2596_v18, %v2596_v18  ;;  %3500 = vmatpush1.bf16.msra.mxu1 %v4325_v45 }
 0x3ac   :  { %3510 = vmatprep.subr.bf16.mxu1 %v4330_v17  ;;  %p4476_p8 = pnand %p4475_p7, %p4469_p4 }
 0x3ad   :  { %3501 = vmatprep.mubr.bf16.mxu1 %v2604_v19 }
 0x3ae   :  { %3502 = vmatmul.mubr.bf16.vlgmr.msra.gmra.mrb[8].mxu1 %v2603_v22 }
 0x3af   :  { %3511 = vmatpush1.bf16.msra.mxu1 %v4328_v20 }
 0x3b0   :  { %3512 = vmatprep.subr.bf16.mxu1 %v4333_v24 }
 0x3b3   :  { %3513 = vmatpush1.bf16.msra.mxu1 %v4331_v25 }
 0x3b4   :  { %3514 = vmatprep.subr.bf16.mxu1 %v4336_v26 }
 0x3b7   :  { %3515 = vmatpush1.bf16.msra.mxu1 %v4334_v28 }
 0x3b8   :  { %3516 = vmatprep.subr.bf16.mxu1 %v4339_v30 }
 0x3bb   :  { %3517 = vmatpush1.bf16.msra.mxu1 %v4337_v31 }
 0x3bc   :  { %3518 = vmatprep.subr.bf16.mxu1 %v4342_v54 }
 0x3bf   :  { %3519 = vmatpush1.bf16.msra.mxu1 %v4340_v32 }
 0x3c0   :  { %3520 = vmatprep.subr.bf16.mxu1 %v4345_v34 }
 0x3c3   :  { %3521 = vmatpush1.bf16.msra.mxu1 %v4343_v35 }
 0x3c4   :  { %3522 = vmatprep.subr.bf16.mxu1 %v4348_v55 }
 0x3c7   :  { %3523 = vmatpush1.bf16.msra.mxu1 %v4346_v36 }
 0x3c8   :  { %3524 = vmatprep.subr.bf16.mxu1 %v4351_v37 }
 0x3cb   :  { %3525 = vmatpush1.bf16.msra.mxu1 %v4349_v42 }
 0x3cc   :  { %3526 = vmatprep.subr.bf16.mxu1 %v4354_v38 }
 0x3cf   :  { %3527 = vmatpush1.bf16.msra.mxu1 %v4352_v39 }
 0x3d0   :  { %3528 = vmatprep.subr.bf16.mxu1 %v4357_v44 }
 0x3d3   :  { %3529 = vmatpush1.bf16.msra.mxu1 %v4355_v23 }
 0x3d4   :  { %3530 = vmatprep.subr.bf16.mxu1 %v4360_v46 }
 0x3d7   :  { %3531 = vmatpush1.bf16.msra.mxu1 %v4358_v47 }
 0x3d8   :  { %3532 = vmatprep.subr.bf16.mxu1 %v4363_v48 }
 0x3db   :  { %3533 = vmatpush1.bf16.msra.mxu1 %v4361_v49 }
 0x3dc   :  { %3534 = vmatprep.subr.bf16.mxu1 %v4366_v50 }
 0x3df   :  { %3535 = vmatpush1.bf16.msra.mxu1 %v4364_v51 }
 0x3e0   :  { %3536 = vmatprep.subr.bf16.mxu1 %v4369_v52 }
 0x3e3   :  { %3537 = vmatpush1.bf16.msra.mxu1 %v4367_v27 }
 0x3e4   :  { %v2576_v62 = vpop.f32.mrb[20].mxu0  ;;  %3538 = vmatprep.subr.bf16.mxu1 %v4372_v29 }
 0x3e5   :  { %v4042_v0 = vadd.f32 %v2576_v62, %v962_v57  ;;  %v2578_v1 = vpop.f32.mrb[21].mxu0 }
 0x3e6   :  { %v4043_v2 = vadd.f32 %v2578_v1, %v966_v58  ;;  %v2580_v3 = vpop.f32.mrb[22].mxu0 }
 0x3e7   :  { %v2589_v6 = vmul.f32 0.2, %v4042_v0  ;;  %v2581_v7 = vpop.f32.mrb[23].mxu0  ;;  %3539 = vmatpush1.bf16.msra.mxu1 %v4370_v59 }
 0x3e8   :  { %v2590_v60 = vmul.f32 0.2, %v4043_v2  ;;  %3540 = vmatprep.subr.bf16.mxu1 %v4375_v63 }
 0x3e9   :  { %v2597_v9 = vmax.f32 %v4042_v0, %v2589_v6 }
 0x3ea   :  { %v2598_v10 = vmax.f32 %v4043_v2, %v2590_v60 }
 0x3eb   :  { %3541 = vmatpush1.bf16.msra.mxu1 %v4373_v40  ;;  %v2605_v33 = vpack.c.bf16 %v2597_v9, %v2597_v9 }
 0x3ec   :  { %v2606_v11 = vpack.c.bf16 %v2598_v10, %v2598_v10 }
 0x3ee   :  { %3542 = vmatprep.mubr.bf16.mxu1 %v2606_v11 }
 0x3ef   :  { %3543 = vmatmul.mubr.bf16.vlgmr.msra.gmra.mrb[8].mxu1 %v2605_v33 }
 0x4c2   :  { %v3544_v14 = vpop.f32.mrb[8].mxu1 }
 0x4c3   :  { %v4044_v4 = vadd.f32 %v3544_v14, %v2740_v61  ;;  %v3546_v21 = vpop.f32.mrb[9].mxu1 }
 0x4c4   :  { %v4045_v5 = vadd.f32 %v3546_v21, %v2744_v13  ;;  %v3548_v8 = vpop.f32.mrb[10].mxu1 }
 0x4c5   :  { %4376 = vtanh.f32 %v4044_v4  ;;  %v3549_v15 = vpop.f32.mrb[11].mxu1 }
 0x4c6   :  { %4378 = vtanh.f32 %v4045_v5 }
 0x4cf   :  { %v4377_v45 = vpop.eup %4376 }
 0x4d0   :  { %v4379_v16 = vpop.eup %4378 }
 0x4d1   :  { %v4033_v17 = vpack.c.bf16 %v4379_v16, %v4377_v45 }
 0x4d3   :  { %3561 = vst [vmem:[#allocation10] sm:$0xff] %v4033_v17 }
 0x4d4   :  { %4479 = shalt.err (!%p4476_p8)
}
 0x4d5   :  { %s4480_s24 = scalar_lea.hbm %s4752_s9, 128 }
 0x4d6   :  { %p4481_p9 = scmp.ne.s32.totalorder %s4752_s9, %s4480_s24  ;;  %p4484_p10 = scmp.lt.u32.totalorder %s4480_s24, %s4752_s9 }
 0x4d8   :  { %p4486_p11 = pnand %p4484_p10, %p4481_p9 }
 0x4da   :  { %4489 = shalt.err (!%p4486_p11)
}
 0x4db   :  { %3571 = dma.vmem_to_hbm [thread:$0]  %s3569_s23, 128, %s4752_s9, [#allocation4]  }
 0x4dc   :  { %4496 = dma.done.wait [#allocation4], 128  }
 0x4dd   :  { %4497 = vsyncadd [#allocation4], 4294967168 }
 0x4de   :  { %3575 = vsyncpa [#allocation3], 1 }
 0x4df   :  { %3576 = vsyncpa [#allocation6], 1 }
 0x4e0   :  { %3577 = vsyncpa [#allocation9], 1 }
 0x4e1   :  { %3578 = vsyncpa [#allocation4], 1 }

</bundles_post_ra>
